<compile_context>
chip_gen: v6e
topology: v6e:2x2x1
jax: 0.10.0
libtpu: 0.0.40
codegen_flags: <defaults>
</compile_context>

<pallas_src>
import functools

import jax
import jax.numpy as jnp
from jax.experimental import pallas as pl
from jax.experimental.pallas import tpu as pltpu


# ----------------------------- Pallas kernels ------------------------------

def _conv_bn_relu_pool_kernel(a0_ref, a1_ref, a2_ref, a3_ref, w_ref, s_ref,
                              o_ref):
    # Fused Conv (as matmul over pre-gathered patches) + folded-BN/bias add
    # + ReLU + MaxPool2d(2,2).  Each a*_ref is the im2col slab for one of the
    # four 2x2 pooling-window positions; the max over them IS the pool.
    w = w_ref[...]           # (K, Cout) bf16, BN scale folded in
    s = s_ref[...]           # (1, Cout) f32, conv bias + BN shift folded in

    def branch(a_ref):
        y = jnp.dot(a_ref[...], w, preferred_element_type=jnp.float32) + s
        return jnp.maximum(y, 0.0)                       # activation = ReLU

    o_ref[...] = jnp.maximum(jnp.maximum(branch(a0_ref), branch(a1_ref)),
                             jnp.maximum(branch(a2_ref), branch(a3_ref)))


def _dense_block_softmax_kernel(x_ref, w1_ref, b1_ref, w2_ref, b2_ref, o_ref):
    # Flatten(x) @ W1 + b1  ->  (Dropout = identity)  ->  @ W2 + b2 -> softmax.
    # Hidden activation stays in registers/VMEM; only the (n, out) probs are
    # written to HBM.
    h = jnp.dot(x_ref[...], w1_ref[...],
                preferred_element_type=jnp.float32) + b1_ref[...]
    y = jnp.dot(h.astype(w2_ref.dtype), w2_ref[...],
                preferred_element_type=jnp.float32) + b2_ref[...]
    y = y - jnp.max(y, axis=-1, keepdims=True)
    e = jnp.exp(y)
    o_ref[...] = e / jnp.sum(e, axis=-1, keepdims=True)


# ------------------------------ call helper --------------------------------

def _full_spec(shape):
    nd = len(shape)
    # Whole-array block (block shape == array shape), trivial index map.
    return pl.BlockSpec(tuple(shape), lambda i, _nd=nd: (0,) * _nd)


def _call(kernel, inputs, out_struct):
    return pl.pallas_call(
        kernel,
        grid=(1,),
        in_specs=[_full_spec(x.shape) for x in inputs],
        out_specs=_full_spec(out_struct.shape),
        out_shape=out_struct,
        compiler_params=pltpu.CompilerParams(
            dimension_semantics=("arbitrary",)),
    )(*inputs)


# ------------------------------ layer wrappers ------------------------------

def conv_bn_relu_pool(x_nhwc, w, b, scale, shift, k, pad=2):
    """Conv2d(padding=2) + BatchNorm(eval) + ReLU + MaxPool2d(2,2), one kernel."""
    n, h, wd, c = x_nhwc.shape
    cout = w.shape[0]
    xp = jnp.pad(x_nhwc, ((0, 0), (pad, pad), (pad, pad), (0, 0)))
    ho = h + 2 * pad - k + 1
    wo = wd + 2 * pad - k + 1
    hp, wp = ho // 2, wo // 2          # pool floor (PyTorch default)

    # Fold BN scale into the weights and (conv bias + BN shift) into one vector
    # — wrapper-side, removes the per-element mul/add from the VPU epilogue.
    w_mat = jnp.transpose(w, (2, 3, 1, 0)).reshape(k * k * c, cout)  # (kh,kw,cin)
    w_fused = (w_mat * scale[None, :]).astype(jnp.bfloat16)
    shift_fused = (b * scale + shift).reshape(1, cout).astype(jnp.float32)

    # im2col (layout glue, XLA): columns ordered (kh, kw, cin) to match w_mat.
    taps = [xp[:, i:i + ho, j:j + wo, :] for i in range(k) for j in range(k)]
    a_full = jnp.concatenate(taps, axis=-1)            # (n, ho, wo, k*k*c)
    # Four pooling-window views (stride-2 sampling of conv-output positions);
    # the pre-pool activation never hits HBM — the max happens in-kernel.
    slabs = [
        a_full[:, pi:pi + 2 * hp:2, pj:pj + 2 * wp:2, :]
        .reshape(n * hp * wp, k * k * c).astype(jnp.bfloat16)
        for pi in range(2) for pj in range(2)
    ]

    out = _call(
        _conv_bn_relu_pool_kernel,
        slabs + [w_fused, shift_fused],
        jax.ShapeDtypeStruct((n * hp * wp, cout), jnp.float32),
    )
    return out.reshape(n, hp, wp, cout)


# ------------------------------ parameters ----------------------------------

def init_params(key, kernels, input_shape, hidden_unit, output_size, factor,
                spatial):
    layer_size = [input_shape] + [hidden_unit] + [factor * hidden_unit] * 4
    keys = jax.random.split(key, 40)
    ki = 0
    params = {"conv": [], "bn": []}
    h = spatial
    for i in range(5):
        cin, cout, k = layer_size[i], layer_size[i + 1], kernels[i]
        wk = 0.1 * jax.random.normal(keys[ki], (cout, cin, k, k), jnp.float32); ki += 1
        bk = 0.1 * jax.random.normal(keys[ki], (cout,), jnp.float32); ki += 1
        params["conv"].append((wk, bk))
        gamma = 1.0 + 0.1 * jax.random.normal(keys[ki], (cout,), jnp.float32); ki += 1
        beta = 0.1 * jax.random.normal(keys[ki], (cout,), jnp.float32); ki += 1
        rmean = 0.1 * jax.random.normal(keys[ki], (cout,), jnp.float32); ki += 1
        rvar = 0.5 + jnp.abs(jax.random.normal(keys[ki], (cout,), jnp.float32)); ki += 1
        params["bn"].append((gamma, beta, rmean, rvar))
        h = (h + 2 * 2 - k + 1) // 2  # conv (padding=2) then pool
    flat = layer_size[-1] * h * h      # nn.LazyLinear in_features
    w1 = 0.05 * jax.random.normal(keys[ki], (flat, 1024), jnp.float32); ki += 1
    b1 = 0.05 * jax.random.normal(keys[ki], (1024,), jnp.float32); ki += 1
    w2 = 0.05 * jax.random.normal(keys[ki], (1024, output_size), jnp.float32); ki += 1
    b2 = 0.05 * jax.random.normal(keys[ki], (output_size,), jnp.float32); ki += 1
    params["dense1"] = (w1, b1)
    params["dense2"] = (w2, b2)
    return params


# ------------------------------- forward ------------------------------------

def forward(params, x_nchw, kernels, batch_norm=True):
    eps = 1e-5
    x = jnp.transpose(x_nchw, (0, 2, 3, 1)).astype(jnp.float32)  # NCHW -> NHWC
    for i in range(5):
        w, b = params["conv"][i]
        if batch_norm:
            gamma, beta, rmean, rvar = params["bn"][i]
            scale = gamma * jax.lax.rsqrt(rvar + eps)
            shift = beta - rmean * scale
        else:
            cout = w.shape[0]
            scale = jnp.ones((cout,), jnp.float32)
            shift = jnp.zeros((cout,), jnp.float32)
        x = conv_bn_relu_pool(x, w, b, scale, shift, kernels[i])
    # nn.Dropout: identity at inference.
    n = x.shape[0]
    # nn.Flatten on NCHW -> transpose back before flattening (torch ordering).
    x = jnp.transpose(x, (0, 3, 1, 2)).reshape(n, -1)
    w1, b1 = params["dense1"]
    w2, b2 = params["dense2"]
    out = _call(
        _dense_block_softmax_kernel,
        [x.astype(jnp.bfloat16),
         w1.astype(jnp.bfloat16), b1.reshape(1, -1).astype(jnp.float32),
         w2.astype(jnp.bfloat16), b2.reshape(1, -1).astype(jnp.float32)],
        jax.ShapeDtypeStruct((n, w2.shape[1]), jnp.float32),
    )
    return out


# --------------------------------- main --------------------------------------

if __name__ == "__main__":
    key = jax.random.PRNGKey(0)
    pkey, xkey = jax.random.split(key)

    # Synthetic config matching the module's __init__ signature.
    kernels = (3, 5, 3, 3, 3)
    inputShape, hiddenUnit, outputSize, factor = 3, 8, 10, 2
    dropOut, batchNorm = 0.25, True   # dropout -> identity at inference
    batch, spatial = 2, 16

    params = init_params(pkey, kernels, inputShape, hiddenUnit, outputSize,
                         factor, spatial)
    # Input in PyTorch NCHW convention.
    x = jax.random.normal(xkey, (batch, inputShape, spatial, spatial),
                          jnp.float32)

    fwd = jax.jit(functools.partial(forward, kernels=kernels,
                                    batch_norm=batchNorm))
    out = jax.block_until_ready(fwd(params, x))

    assert out.shape == (batch, outputSize), out.shape
    assert bool(jnp.all(jnp.isfinite(out)))
    assert bool(jnp.allclose(jnp.sum(out, axis=1), 1.0, atol=1e-5))  # softmax rows
    print("KERNEL_OK")
</pallas_src>

<mosaic_0001>
module attributes {stable_mosaic.version = 11 : i64} {
  func.func @_conv_bn_relu_pool_kernel(%arg0: i32, %arg1: memref<162x27xbf16, #tpu.memory_space<vmem>>, %arg2: memref<162x27xbf16, #tpu.memory_space<vmem>>, %arg3: memref<162x27xbf16, #tpu.memory_space<vmem>>, %arg4: memref<162x27xbf16, #tpu.memory_space<vmem>>, %arg5: memref<27x8xbf16, #tpu.memory_space<vmem>>, %arg6: memref<1x8xf32, #tpu.memory_space<vmem>>, %arg7: memref<162x8xf32, #tpu.memory_space<vmem>>) attributes {dimension_semantics = [#tpu.dimension_semantics<arbitrary>], iteration_bounds = array<i64: 1>, scalar_prefetch = 0 : i64, scratch_operands = 0 : i64, tpu.core_type = #tpu.core_type<tc>, window_params = [{pipeline_mode = #tpu.pipeline_mode<synchronous>, transform_indices = @transform_0, window_bounds = array<i64: 162, 27>}, {pipeline_mode = #tpu.pipeline_mode<synchronous>, transform_indices = @transform_1, window_bounds = array<i64: 162, 27>}, {pipeline_mode = #tpu.pipeline_mode<synchronous>, transform_indices = @transform_2, window_bounds = array<i64: 162, 27>}, {pipeline_mode = #tpu.pipeline_mode<synchronous>, transform_indices = @transform_3, window_bounds = array<i64: 162, 27>}, {pipeline_mode = #tpu.pipeline_mode<synchronous>, transform_indices = @transform_4, window_bounds = array<i64: 27, 8>}, {pipeline_mode = #tpu.pipeline_mode<synchronous>, transform_indices = @transform_5, window_bounds = array<i64: 1, 8>}, {pipeline_mode = #tpu.pipeline_mode<synchronous>, transform_indices = @transform_6, window_bounds = array<i64: 162, 8>}]} {
    %c0 = arith.constant 0 : index
    %c0_0 = arith.constant 0 : index
    %0 = vector.load %arg5[%c0, %c0_0] : memref<27x8xbf16, #tpu.memory_space<vmem>>, vector<27x8xbf16>
    %c0_1 = arith.constant 0 : index
    %c0_2 = arith.constant 0 : index
    %1 = vector.load %arg6[%c0_1, %c0_2] : memref<1x8xf32, #tpu.memory_space<vmem>>, vector<1x8xf32>
    %c0_3 = arith.constant 0 : index
    %c0_4 = arith.constant 0 : index
    %2 = vector.load %arg1[%c0_3, %c0_4] : memref<162x27xbf16, #tpu.memory_space<vmem>>, vector<162x27xbf16>
    %cst = arith.constant dense<0.000000e+00> : vector<162x8xf32>
    %3 = tpu.matmul %2, %0, %cst {dimension_numbers = #tpu.dot_dimension_numbers<[1], [0], [0], [1], [0, 0, 1, 1], [], []>} : vector<162x27xbf16>, vector<27x8xbf16>, vector<162x8xf32> -> vector<162x8xf32>
    %4 = vector.broadcast %1 : vector<1x8xf32> to vector<162x8xf32>
    %5 = arith.addf %3, %4 : vector<162x8xf32>
    %cst_5 = arith.constant 0.000000e+00 : f32
    %6 = vector.broadcast %cst_5 : f32 to vector<162x8xf32>
    %7 = arith.maximumf %5, %6 : vector<162x8xf32>
    %c0_6 = arith.constant 0 : index
    %c0_7 = arith.constant 0 : index
    %8 = vector.load %arg2[%c0_6, %c0_7] : memref<162x27xbf16, #tpu.memory_space<vmem>>, vector<162x27xbf16>
    %cst_8 = arith.constant dense<0.000000e+00> : vector<162x8xf32>
    %9 = tpu.matmul %8, %0, %cst_8 {dimension_numbers = #tpu.dot_dimension_numbers<[1], [0], [0], [1], [0, 0, 1, 1], [], []>} : vector<162x27xbf16>, vector<27x8xbf16>, vector<162x8xf32> -> vector<162x8xf32>
    %10 = vector.broadcast %1 : vector<1x8xf32> to vector<162x8xf32>
    %11 = arith.addf %9, %10 : vector<162x8xf32>
    %cst_9 = arith.constant 0.000000e+00 : f32
    %12 = vector.broadcast %cst_9 : f32 to vector<162x8xf32>
    %13 = arith.maximumf %11, %12 : vector<162x8xf32>
    %14 = arith.maximumf %7, %13 : vector<162x8xf32>
    %c0_10 = arith.constant 0 : index
    %c0_11 = arith.constant 0 : index
    %15 = vector.load %arg3[%c0_10, %c0_11] : memref<162x27xbf16, #tpu.memory_space<vmem>>, vector<162x27xbf16>
    %cst_12 = arith.constant dense<0.000000e+00> : vector<162x8xf32>
    %16 = tpu.matmul %15, %0, %cst_12 {dimension_numbers = #tpu.dot_dimension_numbers<[1], [0], [0], [1], [0, 0, 1, 1], [], []>} : vector<162x27xbf16>, vector<27x8xbf16>, vector<162x8xf32> -> vector<162x8xf32>
    %17 = vector.broadcast %1 : vector<1x8xf32> to vector<162x8xf32>
    %18 = arith.addf %16, %17 : vector<162x8xf32>
    %cst_13 = arith.constant 0.000000e+00 : f32
    %19 = vector.broadcast %cst_13 : f32 to vector<162x8xf32>
    %20 = arith.maximumf %18, %19 : vector<162x8xf32>
    %c0_14 = arith.constant 0 : index
    %c0_15 = arith.constant 0 : index
    %21 = vector.load %arg4[%c0_14, %c0_15] : memref<162x27xbf16, #tpu.memory_space<vmem>>, vector<162x27xbf16>
    %cst_16 = arith.constant dense<0.000000e+00> : vector<162x8xf32>
    %22 = tpu.matmul %21, %0, %cst_16 {dimension_numbers = #tpu.dot_dimension_numbers<[1], [0], [0], [1], [0, 0, 1, 1], [], []>} : vector<162x27xbf16>, vector<27x8xbf16>, vector<162x8xf32> -> vector<162x8xf32>
    %23 = vector.broadcast %1 : vector<1x8xf32> to vector<162x8xf32>
    %24 = arith.addf %22, %23 : vector<162x8xf32>
    %cst_17 = arith.constant 0.000000e+00 : f32
    %25 = vector.broadcast %cst_17 : f32 to vector<162x8xf32>
    %26 = arith.maximumf %24, %25 : vector<162x8xf32>
    %27 = arith.maximumf %20, %26 : vector<162x8xf32>
    %28 = arith.maximumf %14, %27 : vector<162x8xf32>
    %c0_18 = arith.constant 0 : index
    %c0_19 = arith.constant 0 : index
    %29 = vector.load %arg7[%c0_18, %c0_19] : memref<162x8xf32, #tpu.memory_space<vmem>>, vector<162x8xf32>
    tpu.vector_store %arg7[%c0_18, %c0_19], %28 {strides = array<i32>} : memref<162x8xf32, #tpu.memory_space<vmem>>, vector<162x8xf32>,
    return
  }
  func.func @transform_0(%arg0: i32) -> (i32, i32) {
    %c0_i32 = arith.constant 0 : i32
    %c0_i32_0 = arith.constant 0 : i32
    %c0_i32_1 = arith.constant 0 : i32
    return %c0_i32, %c0_i32_0 : i32, i32
  }
  func.func @transform_1(%arg0: i32) -> (i32, i32) {
    %c0_i32 = arith.constant 0 : i32
    %c0_i32_0 = arith.constant 0 : i32
    %c0_i32_1 = arith.constant 0 : i32
    return %c0_i32, %c0_i32_0 : i32, i32
  }
  func.func @transform_2(%arg0: i32) -> (i32, i32) {
    %c0_i32 = arith.constant 0 : i32
    %c0_i32_0 = arith.constant 0 : i32
    %c0_i32_1 = arith.constant 0 : i32
    return %c0_i32, %c0_i32_0 : i32, i32
  }
  func.func @transform_3(%arg0: i32) -> (i32, i32) {
    %c0_i32 = arith.constant 0 : i32
    %c0_i32_0 = arith.constant 0 : i32
    %c0_i32_1 = arith.constant 0 : i32
    return %c0_i32, %c0_i32_0 : i32, i32
  }
  func.func @transform_4(%arg0: i32) -> (i32, i32) {
    %c0_i32 = arith.constant 0 : i32
    %c0_i32_0 = arith.constant 0 : i32
    %c0_i32_1 = arith.constant 0 : i32
    return %c0_i32, %c0_i32_0 : i32, i32
  }
  func.func @transform_5(%arg0: i32) -> (i32, i32) {
    %c0_i32 = arith.constant 0 : i32
    %c0_i32_0 = arith.constant 0 : i32
    %c0_i32_1 = arith.constant 0 : i32
    return %c0_i32, %c0_i32_0 : i32, i32
  }
  func.func @transform_6(%arg0: i32) -> (i32, i32) {
    %c0_i32 = arith.constant 0 : i32
    %c0_i32_0 = arith.constant 0 : i32
    %c0_i32_1 = arith.constant 0 : i32
    return %c0_i32, %c0_i32_0 : i32, i32
  }
}

module attributes {stable_mosaic.version = 11 : i64} {
  func.func @_conv_bn_relu_pool_kernel(%arg0: i32, %arg1: memref<32x200xbf16, #tpu.memory_space<vmem>>, %arg2: memref<32x200xbf16, #tpu.memory_space<vmem>>, %arg3: memref<32x200xbf16, #tpu.memory_space<vmem>>, %arg4: memref<32x200xbf16, #tpu.memory_space<vmem>>, %arg5: memref<200x16xbf16, #tpu.memory_space<vmem>>, %arg6: memref<1x16xf32, #tpu.memory_space<vmem>>, %arg7: memref<32x16xf32, #tpu.memory_space<vmem>>) attributes {dimension_semantics = [#tpu.dimension_semantics<arbitrary>], iteration_bounds = array<i64: 1>, scalar_prefetch = 0 : i64, scratch_operands = 0 : i64, tpu.core_type = #tpu.core_type<tc>, window_params = [{pipeline_mode = #tpu.pipeline_mode<synchronous>, transform_indices = @transform_0, window_bounds = array<i64: 32, 200>}, {pipeline_mode = #tpu.pipeline_mode<synchronous>, transform_indices = @transform_1, window_bounds = array<i64: 32, 200>}, {pipeline_mode = #tpu.pipeline_mode<synchronous>, transform_indices = @transform_2, window_bounds = array<i64: 32, 200>}, {pipeline_mode = #tpu.pipeline_mode<synchronous>, transform_indices = @transform_3, window_bounds = array<i64: 32, 200>}, {pipeline_mode = #tpu.pipeline_mode<synchronous>, transform_indices = @transform_4, window_bounds = array<i64: 200, 16>}, {pipeline_mode = #tpu.pipeline_mode<synchronous>, transform_indices = @transform_5, window_bounds = array<i64: 1, 16>}, {pipeline_mode = #tpu.pipeline_mode<synchronous>, transform_indices = @transform_6, window_bounds = array<i64: 32, 16>}]} {
    %c0 = arith.constant 0 : index
    %c0_0 = arith.constant 0 : index
    %0 = vector.load %arg5[%c0, %c0_0] : memref<200x16xbf16, #tpu.memory_space<vmem>>, vector<200x16xbf16>
    %c0_1 = arith.constant 0 : index
    %c0_2 = arith.constant 0 : index
    %1 = vector.load %arg6[%c0_1, %c0_2] : memref<1x16xf32, #tpu.memory_space<vmem>>, vector<1x16xf32>
    %c0_3 = arith.constant 0 : index
    %c0_4 = arith.constant 0 : index
    %2 = vector.load %arg1[%c0_3, %c0_4] : memref<32x200xbf16, #tpu.memory_space<vmem>>, vector<32x200xbf16>
    %cst = arith.constant dense<0.000000e+00> : vector<32x16xf32>
    %3 = tpu.matmul %2, %0, %cst {dimension_numbers = #tpu.dot_dimension_numbers<[1], [0], [0], [1], [0, 0, 1, 1], [], []>} : vector<32x200xbf16>, vector<200x16xbf16>, vector<32x16xf32> -> vector<32x16xf32>
    %4 = vector.broadcast %1 : vector<1x16xf32> to vector<32x16xf32>
    %5 = arith.addf %3, %4 : vector<32x16xf32>
    %cst_5 = arith.constant 0.000000e+00 : f32
    %6 = vector.broadcast %cst_5 : f32 to vector<32x16xf32>
    %7 = arith.maximumf %5, %6 : vector<32x16xf32>
    %c0_6 = arith.constant 0 : index
    %c0_7 = arith.constant 0 : index
    %8 = vector.load %arg2[%c0_6, %c0_7] : memref<32x200xbf16, #tpu.memory_space<vmem>>, vector<32x200xbf16>
    %cst_8 = arith.constant dense<0.000000e+00> : vector<32x16xf32>
    %9 = tpu.matmul %8, %0, %cst_8 {dimension_numbers = #tpu.dot_dimension_numbers<[1], [0], [0], [1], [0, 0, 1, 1], [], []>} : vector<32x200xbf16>, vector<200x16xbf16>, vector<32x16xf32> -> vector<32x16xf32>
    %10 = vector.broadcast %1 : vector<1x16xf32> to vector<32x16xf32>
    %11 = arith.addf %9, %10 : vector<32x16xf32>
    %cst_9 = arith.constant 0.000000e+00 : f32
    %12 = vector.broadcast %cst_9 : f32 to vector<32x16xf32>
    %13 = arith.maximumf %11, %12 : vector<32x16xf32>
    %14 = arith.maximumf %7, %13 : vector<32x16xf32>
    %c0_10 = arith.constant 0 : index
    %c0_11 = arith.constant 0 : index
    %15 = vector.load %arg3[%c0_10, %c0_11] : memref<32x200xbf16, #tpu.memory_space<vmem>>, vector<32x200xbf16>
    %cst_12 = arith.constant dense<0.000000e+00> : vector<32x16xf32>
    %16 = tpu.matmul %15, %0, %cst_12 {dimension_numbers = #tpu.dot_dimension_numbers<[1], [0], [0], [1], [0, 0, 1, 1], [], []>} : vector<32x200xbf16>, vector<200x16xbf16>, vector<32x16xf32> -> vector<32x16xf32>
    %17 = vector.broadcast %1 : vector<1x16xf32> to vector<32x16xf32>
    %18 = arith.addf %16, %17 : vector<32x16xf32>
    %cst_13 = arith.constant 0.000000e+00 : f32
    %19 = vector.broadcast %cst_13 : f32 to vector<32x16xf32>
    %20 = arith.maximumf %18, %19 : vector<32x16xf32>
    %c0_14 = arith.constant 0 : index
    %c0_15 = arith.constant 0 : index
    %21 = vector.load %arg4[%c0_14, %c0_15] : memref<32x200xbf16, #tpu.memory_space<vmem>>, vector<32x200xbf16>
    %cst_16 = arith.constant dense<0.000000e+00> : vector<32x16xf32>
    %22 = tpu.matmul %21, %0, %cst_16 {dimension_numbers = #tpu.dot_dimension_numbers<[1], [0], [0], [1], [0, 0, 1, 1], [], []>} : vector<32x200xbf16>, vector<200x16xbf16>, vector<32x16xf32> -> vector<32x16xf32>
    %23 = vector.broadcast %1 : vector<1x16xf32> to vector<32x16xf32>
    %24 = arith.addf %22, %23 : vector<32x16xf32>
    %cst_17 = arith.constant 0.000000e+00 : f32
    %25 = vector.broadcast %cst_17 : f32 to vector<32x16xf32>
    %26 = arith.maximumf %24, %25 : vector<32x16xf32>
    %27 = arith.maximumf %20, %26 : vector<32x16xf32>
    %28 = arith.maximumf %14, %27 : vector<32x16xf32>
    %c0_18 = arith.constant 0 : index
    %c0_19 = arith.constant 0 : index
    %29 = vector.load %arg7[%c0_18, %c0_19] : memref<32x16xf32, #tpu.memory_space<vmem>>, vector<32x16xf32>
    tpu.vector_store %arg7[%c0_18, %c0_19], %28 {strides = array<i32>} : memref<32x16xf32, #tpu.memory_space<vmem>>, vector<32x16xf32>,
    return
  }
  func.func @transform_0(%arg0: i32) -> (i32, i32) {
    %c0_i32 = arith.constant 0 : i32
    %c0_i32_0 = arith.constant 0 : i32
    %c0_i32_1 = arith.constant 0 : i32
    return %c0_i32, %c0_i32_0 : i32, i32
  }
  func.func @transform_1(%arg0: i32) -> (i32, i32) {
    %c0_i32 = arith.constant 0 : i32
    %c0_i32_0 = arith.constant 0 : i32
    %c0_i32_1 = arith.constant 0 : i32
    return %c0_i32, %c0_i32_0 : i32, i32
  }
  func.func @transform_2(%arg0: i32) -> (i32, i32) {
    %c0_i32 = arith.constant 0 : i32
    %c0_i32_0 = arith.constant 0 : i32
    %c0_i32_1 = arith.constant 0 : i32
    return %c0_i32, %c0_i32_0 : i32, i32
  }
  func.func @transform_3(%arg0: i32) -> (i32, i32) {
    %c0_i32 = arith.constant 0 : i32
    %c0_i32_0 = arith.constant 0 : i32
    %c0_i32_1 = arith.constant 0 : i32
    return %c0_i32, %c0_i32_0 : i32, i32
  }
  func.func @transform_4(%arg0: i32) -> (i32, i32) {
    %c0_i32 = arith.constant 0 : i32
    %c0_i32_0 = arith.constant 0 : i32
    %c0_i32_1 = arith.constant 0 : i32
    return %c0_i32, %c0_i32_0 : i32, i32
  }
  func.func @transform_5(%arg0: i32) -> (i32, i32) {
    %c0_i32 = arith.constant 0 : i32
    %c0_i32_0 = arith.constant 0 : i32
    %c0_i32_1 = arith.constant 0 : i32
    return %c0_i32, %c0_i32_0 : i32, i32
  }
  func.func @transform_6(%arg0: i32) -> (i32, i32) {
    %c0_i32 = arith.constant 0 : i32
    %c0_i32_0 = arith.constant 0 : i32
    %c0_i32_1 = arith.constant 0 : i32
    return %c0_i32, %c0_i32_0 : i32, i32
  }
}

module attributes {stable_mosaic.version = 11 : i64} {
  func.func @_conv_bn_relu_pool_kernel(%arg0: i32, %arg1: memref<18x144xbf16, #tpu.memory_space<vmem>>, %arg2: memref<18x144xbf16, #tpu.memory_space<vmem>>, %arg3: memref<18x144xbf16, #tpu.memory_space<vmem>>, %arg4: memref<18x144xbf16, #tpu.memory_space<vmem>>, %arg5: memref<144x16xbf16, #tpu.memory_space<vmem>>, %arg6: memref<1x16xf32, #tpu.memory_space<vmem>>, %arg7: memref<18x16xf32, #tpu.memory_space<vmem>>) attributes {dimension_semantics = [#tpu.dimension_semantics<arbitrary>], iteration_bounds = array<i64: 1>, scalar_prefetch = 0 : i64, scratch_operands = 0 : i64, tpu.core_type = #tpu.core_type<tc>, window_params = [{pipeline_mode = #tpu.pipeline_mode<synchronous>, transform_indices = @transform_0, window_bounds = array<i64: 18, 144>}, {pipeline_mode = #tpu.pipeline_mode<synchronous>, transform_indices = @transform_1, window_bounds = array<i64: 18, 144>}, {pipeline_mode = #tpu.pipeline_mode<synchronous>, transform_indices = @transform_2, window_bounds = array<i64: 18, 144>}, {pipeline_mode = #tpu.pipeline_mode<synchronous>, transform_indices = @transform_3, window_bounds = array<i64: 18, 144>}, {pipeline_mode = #tpu.pipeline_mode<synchronous>, transform_indices = @transform_4, window_bounds = array<i64: 144, 16>}, {pipeline_mode = #tpu.pipeline_mode<synchronous>, transform_indices = @transform_5, window_bounds = array<i64: 1, 16>}, {pipeline_mode = #tpu.pipeline_mode<synchronous>, transform_indices = @transform_6, window_bounds = array<i64: 18, 16>}]} {
    %c0 = arith.constant 0 : index
    %c0_0 = arith.constant 0 : index
    %0 = vector.load %arg5[%c0, %c0_0] : memref<144x16xbf16, #tpu.memory_space<vmem>>, vector<144x16xbf16>
    %c0_1 = arith.constant 0 : index
    %c0_2 = arith.constant 0 : index
    %1 = vector.load %arg6[%c0_1, %c0_2] : memref<1x16xf32, #tpu.memory_space<vmem>>, vector<1x16xf32>
    %c0_3 = arith.constant 0 : index
    %c0_4 = arith.constant 0 : index
    %2 = vector.load %arg1[%c0_3, %c0_4] : memref<18x144xbf16, #tpu.memory_space<vmem>>, vector<18x144xbf16>
    %cst = arith.constant dense<0.000000e+00> : vector<18x16xf32>
    %3 = tpu.matmul %2, %0, %cst {dimension_numbers = #tpu.dot_dimension_numbers<[1], [0], [0], [1], [0, 0, 1, 1], [], []>} : vector<18x144xbf16>, vector<144x16xbf16>, vector<18x16xf32> -> vector<18x16xf32>
    %4 = vector.broadcast %1 : vector<1x16xf32> to vector<18x16xf32>
    %5 = arith.addf %3, %4 : vector<18x16xf32>
    %cst_5 = arith.constant 0.000000e+00 : f32
    %6 = vector.broadcast %cst_5 : f32 to vector<18x16xf32>
    %7 = arith.maximumf %5, %6 : vector<18x16xf32>
    %c0_6 = arith.constant 0 : index
    %c0_7 = arith.constant 0 : index
    %8 = vector.load %arg2[%c0_6, %c0_7] : memref<18x144xbf16, #tpu.memory_space<vmem>>, vector<18x144xbf16>
    %cst_8 = arith.constant dense<0.000000e+00> : vector<18x16xf32>
    %9 = tpu.matmul %8, %0, %cst_8 {dimension_numbers = #tpu.dot_dimension_numbers<[1], [0], [0], [1], [0, 0, 1, 1], [], []>} : vector<18x144xbf16>, vector<144x16xbf16>, vector<18x16xf32> -> vector<18x16xf32>
    %10 = vector.broadcast %1 : vector<1x16xf32> to vector<18x16xf32>
    %11 = arith.addf %9, %10 : vector<18x16xf32>
    %cst_9 = arith.constant 0.000000e+00 : f32
    %12 = vector.broadcast %cst_9 : f32 to vector<18x16xf32>
    %13 = arith.maximumf %11, %12 : vector<18x16xf32>
    %14 = arith.maximumf %7, %13 : vector<18x16xf32>
    %c0_10 = arith.constant 0 : index
    %c0_11 = arith.constant 0 : index
    %15 = vector.load %arg3[%c0_10, %c0_11] : memref<18x144xbf16, #tpu.memory_space<vmem>>, vector<18x144xbf16>
    %cst_12 = arith.constant dense<0.000000e+00> : vector<18x16xf32>
    %16 = tpu.matmul %15, %0, %cst_12 {dimension_numbers = #tpu.dot_dimension_numbers<[1], [0], [0], [1], [0, 0, 1, 1], [], []>} : vector<18x144xbf16>, vector<144x16xbf16>, vector<18x16xf32> -> vector<18x16xf32>
    %17 = vector.broadcast %1 : vector<1x16xf32> to vector<18x16xf32>
    %18 = arith.addf %16, %17 : vector<18x16xf32>
    %cst_13 = arith.constant 0.000000e+00 : f32
    %19 = vector.broadcast %cst_13 : f32 to vector<18x16xf32>
    %20 = arith.maximumf %18, %19 : vector<18x16xf32>
    %c0_14 = arith.constant 0 : index
    %c0_15 = arith.constant 0 : index
    %21 = vector.load %arg4[%c0_14, %c0_15] : memref<18x144xbf16, #tpu.memory_space<vmem>>, vector<18x144xbf16>
    %cst_16 = arith.constant dense<0.000000e+00> : vector<18x16xf32>
    %22 = tpu.matmul %21, %0, %cst_16 {dimension_numbers = #tpu.dot_dimension_numbers<[1], [0], [0], [1], [0, 0, 1, 1], [], []>} : vector<18x144xbf16>, vector<144x16xbf16>, vector<18x16xf32> -> vector<18x16xf32>
    %23 = vector.broadcast %1 : vector<1x16xf32> to vector<18x16xf32>
    %24 = arith.addf %22, %23 : vector<18x16xf32>
    %cst_17 = arith.constant 0.000000e+00 : f32
    %25 = vector.broadcast %cst_17 : f32 to vector<18x16xf32>
    %26 = arith.maximumf %24, %25 : vector<18x16xf32>
    %27 = arith.maximumf %20, %26 : vector<18x16xf32>
    %28 = arith.maximumf %14, %27 : vector<18x16xf32>
    %c0_18 = arith.constant 0 : index
    %c0_19 = arith.constant 0 : index
    %29 = vector.load %arg7[%c0_18, %c0_19] : memref<18x16xf32, #tpu.memory_space<vmem>>, vector<18x16xf32>
    tpu.vector_store %arg7[%c0_18, %c0_19], %28 {strides = array<i32>} : memref<18x16xf32, #tpu.memory_space<vmem>>, vector<18x16xf32>,
    return
  }
  func.func @transform_0(%arg0: i32) -> (i32, i32) {
    %c0_i32 = arith.constant 0 : i32
    %c0_i32_0 = arith.constant 0 : i32
    %c0_i32_1 = arith.constant 0 : i32
    return %c0_i32, %c0_i32_0 : i32, i32
  }
  func.func @transform_1(%arg0: i32) -> (i32, i32) {
    %c0_i32 = arith.constant 0 : i32
    %c0_i32_0 = arith.constant 0 : i32
    %c0_i32_1 = arith.constant 0 : i32
    return %c0_i32, %c0_i32_0 : i32, i32
  }
  func.func @transform_2(%arg0: i32) -> (i32, i32) {
    %c0_i32 = arith.constant 0 : i32
    %c0_i32_0 = arith.constant 0 : i32
    %c0_i32_1 = arith.constant 0 : i32
    return %c0_i32, %c0_i32_0 : i32, i32
  }
  func.func @transform_3(%arg0: i32) -> (i32, i32) {
    %c0_i32 = arith.constant 0 : i32
    %c0_i32_0 = arith.constant 0 : i32
    %c0_i32_1 = arith.constant 0 : i32
    return %c0_i32, %c0_i32_0 : i32, i32
  }
  func.func @transform_4(%arg0: i32) -> (i32, i32) {
    %c0_i32 = arith.constant 0 : i32
    %c0_i32_0 = arith.constant 0 : i32
    %c0_i32_1 = arith.constant 0 : i32
    return %c0_i32, %c0_i32_0 : i32, i32
  }
  func.func @transform_5(%arg0: i32) -> (i32, i32) {
    %c0_i32 = arith.constant 0 : i32
    %c0_i32_0 = arith.constant 0 : i32
    %c0_i32_1 = arith.constant 0 : i32
    return %c0_i32, %c0_i32_0 : i32, i32
  }
  func.func @transform_6(%arg0: i32) -> (i32, i32) {
    %c0_i32 = arith.constant 0 : i32
    %c0_i32_0 = arith.constant 0 : i32
    %c0_i32_1 = arith.constant 0 : i32
    return %c0_i32, %c0_i32_0 : i32, i32
  }
}

module attributes {stable_mosaic.version = 11 : i64} {
  func.func @_conv_bn_relu_pool_kernel(%arg0: i32, %arg1: memref<8x144xbf16, #tpu.memory_space<vmem>>, %arg2: memref<8x144xbf16, #tpu.memory_space<vmem>>, %arg3: memref<8x144xbf16, #tpu.memory_space<vmem>>, %arg4: memref<8x144xbf16, #tpu.memory_space<vmem>>, %arg5: memref<144x16xbf16, #tpu.memory_space<vmem>>, %arg6: memref<1x16xf32, #tpu.memory_space<vmem>>, %arg7: memref<8x16xf32, #tpu.memory_space<vmem>>) attributes {dimension_semantics = [#tpu.dimension_semantics<arbitrary>], iteration_bounds = array<i64: 1>, scalar_prefetch = 0 : i64, scratch_operands = 0 : i64, tpu.core_type = #tpu.core_type<tc>, window_params = [{pipeline_mode = #tpu.pipeline_mode<synchronous>, transform_indices = @transform_0, window_bounds = array<i64: 8, 144>}, {pipeline_mode = #tpu.pipeline_mode<synchronous>, transform_indices = @transform_1, window_bounds = array<i64: 8, 144>}, {pipeline_mode = #tpu.pipeline_mode<synchronous>, transform_indices = @transform_2, window_bounds = array<i64: 8, 144>}, {pipeline_mode = #tpu.pipeline_mode<synchronous>, transform_indices = @transform_3, window_bounds = array<i64: 8, 144>}, {pipeline_mode = #tpu.pipeline_mode<synchronous>, transform_indices = @transform_4, window_bounds = array<i64: 144, 16>}, {pipeline_mode = #tpu.pipeline_mode<synchronous>, transform_indices = @transform_5, window_bounds = array<i64: 1, 16>}, {pipeline_mode = #tpu.pipeline_mode<synchronous>, transform_indices = @transform_6, window_bounds = array<i64: 8, 16>}]} {
    %c0 = arith.constant 0 : index
    %c0_0 = arith.constant 0 : index
    %0 = vector.load %arg5[%c0, %c0_0] : memref<144x16xbf16, #tpu.memory_space<vmem>>, vector<144x16xbf16>
    %c0_1 = arith.constant 0 : index
    %c0_2 = arith.constant 0 : index
    %1 = vector.load %arg6[%c0_1, %c0_2] : memref<1x16xf32, #tpu.memory_space<vmem>>, vector<1x16xf32>
    %c0_3 = arith.constant 0 : index
    %c0_4 = arith.constant 0 : index
    %2 = vector.load %arg1[%c0_3, %c0_4] : memref<8x144xbf16, #tpu.memory_space<vmem>>, vector<8x144xbf16>
    %cst = arith.constant dense<0.000000e+00> : vector<8x16xf32>
    %3 = tpu.matmul %2, %0, %cst {dimension_numbers = #tpu.dot_dimension_numbers<[1], [0], [0], [1], [0, 0, 1, 1], [], []>} : vector<8x144xbf16>, vector<144x16xbf16>, vector<8x16xf32> -> vector<8x16xf32>
    %4 = vector.broadcast %1 : vector<1x16xf32> to vector<8x16xf32>
    %5 = arith.addf %3, %4 : vector<8x16xf32>
    %cst_5 = arith.constant 0.000000e+00 : f32
    %6 = vector.broadcast %cst_5 : f32 to vector<8x16xf32>
    %7 = arith.maximumf %5, %6 : vector<8x16xf32>
    %c0_6 = arith.constant 0 : index
    %c0_7 = arith.constant 0 : index
    %8 = vector.load %arg2[%c0_6, %c0_7] : memref<8x144xbf16, #tpu.memory_space<vmem>>, vector<8x144xbf16>
    %cst_8 = arith.constant dense<0.000000e+00> : vector<8x16xf32>
    %9 = tpu.matmul %8, %0, %cst_8 {dimension_numbers = #tpu.dot_dimension_numbers<[1], [0], [0], [1], [0, 0, 1, 1], [], []>} : vector<8x144xbf16>, vector<144x16xbf16>, vector<8x16xf32> -> vector<8x16xf32>
    %10 = vector.broadcast %1 : vector<1x16xf32> to vector<8x16xf32>
    %11 = arith.addf %9, %10 : vector<8x16xf32>
    %cst_9 = arith.constant 0.000000e+00 : f32
    %12 = vector.broadcast %cst_9 : f32 to vector<8x16xf32>
    %13 = arith.maximumf %11, %12 : vector<8x16xf32>
    %14 = arith.maximumf %7, %13 : vector<8x16xf32>
    %c0_10 = arith.constant 0 : index
    %c0_11 = arith.constant 0 : index
    %15 = vector.load %arg3[%c0_10, %c0_11] : memref<8x144xbf16, #tpu.memory_space<vmem>>, vector<8x144xbf16>
    %cst_12 = arith.constant dense<0.000000e+00> : vector<8x16xf32>
    %16 = tpu.matmul %15, %0, %cst_12 {dimension_numbers = #tpu.dot_dimension_numbers<[1], [0], [0], [1], [0, 0, 1, 1], [], []>} : vector<8x144xbf16>, vector<144x16xbf16>, vector<8x16xf32> -> vector<8x16xf32>
    %17 = vector.broadcast %1 : vector<1x16xf32> to vector<8x16xf32>
    %18 = arith.addf %16, %17 : vector<8x16xf32>
    %cst_13 = arith.constant 0.000000e+00 : f32
    %19 = vector.broadcast %cst_13 : f32 to vector<8x16xf32>
    %20 = arith.maximumf %18, %19 : vector<8x16xf32>
    %c0_14 = arith.constant 0 : index
    %c0_15 = arith.constant 0 : index
    %21 = vector.load %arg4[%c0_14, %c0_15] : memref<8x144xbf16, #tpu.memory_space<vmem>>, vector<8x144xbf16>
    %cst_16 = arith.constant dense<0.000000e+00> : vector<8x16xf32>
    %22 = tpu.matmul %21, %0, %cst_16 {dimension_numbers = #tpu.dot_dimension_numbers<[1], [0], [0], [1], [0, 0, 1, 1], [], []>} : vector<8x144xbf16>, vector<144x16xbf16>, vector<8x16xf32> -> vector<8x16xf32>
    %23 = vector.broadcast %1 : vector<1x16xf32> to vector<8x16xf32>
    %24 = arith.addf %22, %23 : vector<8x16xf32>
    %cst_17 = arith.constant 0.000000e+00 : f32
    %25 = vector.broadcast %cst_17 : f32 to vector<8x16xf32>
    %26 = arith.maximumf %24, %25 : vector<8x16xf32>
    %27 = arith.maximumf %20, %26 : vector<8x16xf32>
    %28 = arith.maximumf %14, %27 : vector<8x16xf32>
    %c0_18 = arith.constant 0 : index
    %c0_19 = arith.constant 0 : index
    %29 = vector.load %arg7[%c0_18, %c0_19] : memref<8x16xf32, #tpu.memory_space<vmem>>, vector<8x16xf32>
    tpu.vector_store %arg7[%c0_18, %c0_19], %28 {strides = array<i32>} : memref<8x16xf32, #tpu.memory_space<vmem>>, vector<8x16xf32>,
    return
  }
  func.func @transform_0(%arg0: i32) -> (i32, i32) {
    %c0_i32 = arith.constant 0 : i32
    %c0_i32_0 = arith.constant 0 : i32
    %c0_i32_1 = arith.constant 0 : i32
    return %c0_i32, %c0_i32_0 : i32, i32
  }
  func.func @transform_1(%arg0: i32) -> (i32, i32) {
    %c0_i32 = arith.constant 0 : i32
    %c0_i32_0 = arith.constant 0 : i32
    %c0_i32_1 = arith.constant 0 : i32
    return %c0_i32, %c0_i32_0 : i32, i32
  }
  func.func @transform_2(%arg0: i32) -> (i32, i32) {
    %c0_i32 = arith.constant 0 : i32
    %c0_i32_0 = arith.constant 0 : i32
    %c0_i32_1 = arith.constant 0 : i32
    return %c0_i32, %c0_i32_0 : i32, i32
  }
  func.func @transform_3(%arg0: i32) -> (i32, i32) {
    %c0_i32 = arith.constant 0 : i32
    %c0_i32_0 = arith.constant 0 : i32
    %c0_i32_1 = arith.constant 0 : i32
    return %c0_i32, %c0_i32_0 : i32, i32
  }
  func.func @transform_4(%arg0: i32) -> (i32, i32) {
    %c0_i32 = arith.constant 0 : i32
    %c0_i32_0 = arith.constant 0 : i32
    %c0_i32_1 = arith.constant 0 : i32
    return %c0_i32, %c0_i32_0 : i32, i32
  }
  func.func @transform_5(%arg0: i32) -> (i32, i32) {
    %c0_i32 = arith.constant 0 : i32
    %c0_i32_0 = arith.constant 0 : i32
    %c0_i32_1 = arith.constant 0 : i32
    return %c0_i32, %c0_i32_0 : i32, i32
  }
  func.func @transform_6(%arg0: i32) -> (i32, i32) {
    %c0_i32 = arith.constant 0 : i32
    %c0_i32_0 = arith.constant 0 : i32
    %c0_i32_1 = arith.constant 0 : i32
    return %c0_i32, %c0_i32_0 : i32, i32
  }
}

module attributes {stable_mosaic.version = 11 : i64} {
  func.func @_dense_block_softmax_kernel(%arg0: i32, %arg1: memref<2x64xbf16, #tpu.memory_space<vmem>>, %arg2: memref<64x1024xbf16, #tpu.memory_space<vmem>>, %arg3: memref<1x1024xf32, #tpu.memory_space<vmem>>, %arg4: memref<1024x10xbf16, #tpu.memory_space<vmem>>, %arg5: memref<1x10xf32, #tpu.memory_space<vmem>>, %arg6: memref<2x10xf32, #tpu.memory_space<vmem>>) attributes {dimension_semantics = [#tpu.dimension_semantics<arbitrary>], iteration_bounds = array<i64: 1>, scalar_prefetch = 0 : i64, scratch_operands = 0 : i64, tpu.core_type = #tpu.core_type<tc>, window_params = [{pipeline_mode = #tpu.pipeline_mode<synchronous>, transform_indices = @transform_0, window_bounds = array<i64: 2, 64>}, {pipeline_mode = #tpu.pipeline_mode<synchronous>, transform_indices = @transform_1, window_bounds = array<i64: 64, 1024>}, {pipeline_mode = #tpu.pipeline_mode<synchronous>, transform_indices = @transform_2, window_bounds = array<i64: 1, 1024>}, {pipeline_mode = #tpu.pipeline_mode<synchronous>, transform_indices = @transform_3, window_bounds = array<i64: 1024, 10>}, {pipeline_mode = #tpu.pipeline_mode<synchronous>, transform_indices = @transform_4, window_bounds = array<i64: 1, 10>}, {pipeline_mode = #tpu.pipeline_mode<synchronous>, transform_indices = @transform_5, window_bounds = array<i64: 2, 10>}]} {
    %c0 = arith.constant 0 : index
    %c0_0 = arith.constant 0 : index
    %0 = vector.load %arg1[%c0, %c0_0] : memref<2x64xbf16, #tpu.memory_space<vmem>>, vector<2x64xbf16>
    %c0_1 = arith.constant 0 : index
    %c0_2 = arith.constant 0 : index
    %1 = vector.load %arg2[%c0_1, %c0_2] : memref<64x1024xbf16, #tpu.memory_space<vmem>>, vector<64x1024xbf16>
    %cst = arith.constant dense<0.000000e+00> : vector<2x1024xf32>
    %2 = tpu.matmul %0, %1, %cst {dimension_numbers = #tpu.dot_dimension_numbers<[1], [0], [0], [1], [0, 0, 1, 1], [], []>} : vector<2x64xbf16>, vector<64x1024xbf16>, vector<2x1024xf32> -> vector<2x1024xf32>
    %c0_3 = arith.constant 0 : index
    %c0_4 = arith.constant 0 : index
    %3 = vector.load %arg3[%c0_3, %c0_4] : memref<1x1024xf32, #tpu.memory_space<vmem>>, vector<1x1024xf32>
    %4 = vector.broadcast %3 : vector<1x1024xf32> to vector<2x1024xf32>
    %5 = arith.addf %2, %4 : vector<2x1024xf32>
    %6 = arith.truncf %5 : vector<2x1024xf32> to vector<2x1024xbf16>
    %c0_5 = arith.constant 0 : index
    %c0_6 = arith.constant 0 : index
    %7 = vector.load %arg4[%c0_5, %c0_6] : memref<1024x10xbf16, #tpu.memory_space<vmem>>, vector<1024x10xbf16>
    %cst_7 = arith.constant dense<0.000000e+00> : vector<2x10xf32>
    %8 = tpu.matmul %6, %7, %cst_7 {dimension_numbers = #tpu.dot_dimension_numbers<[1], [0], [0], [1], [0, 0, 1, 1], [], []>} : vector<2x1024xbf16>, vector<1024x10xbf16>, vector<2x10xf32> -> vector<2x10xf32>
    %c0_8 = arith.constant 0 : index
    %c0_9 = arith.constant 0 : index
    %9 = vector.load %arg5[%c0_8, %c0_9] : memref<1x10xf32, #tpu.memory_space<vmem>>, vector<1x10xf32>
    %10 = vector.broadcast %9 : vector<1x10xf32> to vector<2x10xf32>
    %11 = arith.addf %8, %10 : vector<2x10xf32>
    %cst_10 = arith.constant dense<0xFF800000> : vector<2xf32>
    %12 = vector.multi_reduction <maximumf>, %11, %cst_10 [1] : vector<2x10xf32> to vector<2xf32>
    %13 = vector.shape_cast %12 : vector<2xf32> to vector<2x1xf32>
    %14 = vector.broadcast %13 : vector<2x1xf32> to vector<2x10xf32>
    %15 = arith.subf %11, %14 : vector<2x10xf32>
    %16 = math.exp %15 : vector<2x10xf32>
    %cst_11 = arith.constant dense<0.000000e+00> : vector<2xf32>
    %17 = vector.multi_reduction <add>, %16, %cst_11 [1] : vector<2x10xf32> to vector<2xf32>
    %18 = vector.shape_cast %17 : vector<2xf32> to vector<2x1xf32>
    %19 = vector.broadcast %18 : vector<2x1xf32> to vector<2x10xf32>
    %20 = arith.divf %16, %19 : vector<2x10xf32>
    %c0_12 = arith.constant 0 : index
    %c0_13 = arith.constant 0 : index
    %21 = vector.load %arg6[%c0_12, %c0_13] : memref<2x10xf32, #tpu.memory_space<vmem>>, vector<2x10xf32>
    tpu.vector_store %arg6[%c0_12, %c0_13], %20 {strides = array<i32>} : memref<2x10xf32, #tpu.memory_space<vmem>>, vector<2x10xf32>,
    return
  }
  func.func @transform_0(%arg0: i32) -> (i32, i32) {
    %c0_i32 = arith.constant 0 : i32
    %c0_i32_0 = arith.constant 0 : i32
    %c0_i32_1 = arith.constant 0 : i32
    return %c0_i32, %c0_i32_0 : i32, i32
  }
  func.func @transform_1(%arg0: i32) -> (i32, i32) {
    %c0_i32 = arith.constant 0 : i32
    %c0_i32_0 = arith.constant 0 : i32
    %c0_i32_1 = arith.constant 0 : i32
    return %c0_i32, %c0_i32_0 : i32, i32
  }
  func.func @transform_2(%arg0: i32) -> (i32, i32) {
    %c0_i32 = arith.constant 0 : i32
    %c0_i32_0 = arith.constant 0 : i32
    %c0_i32_1 = arith.constant 0 : i32
    return %c0_i32, %c0_i32_0 : i32, i32
  }
  func.func @transform_3(%arg0: i32) -> (i32, i32) {
    %c0_i32 = arith.constant 0 : i32
    %c0_i32_0 = arith.constant 0 : i32
    %c0_i32_1 = arith.constant 0 : i32
    return %c0_i32, %c0_i32_0 : i32, i32
  }
  func.func @transform_4(%arg0: i32) -> (i32, i32) {
    %c0_i32 = arith.constant 0 : i32
    %c0_i32_0 = arith.constant 0 : i32
    %c0_i32_1 = arith.constant 0 : i32
    return %c0_i32, %c0_i32_0 : i32, i32
  }
  func.func @transform_5(%arg0: i32) -> (i32, i32) {
    %c0_i32 = arith.constant 0 : i32
    %c0_i32_0 = arith.constant 0 : i32
    %c0_i32_1 = arith.constant 0 : i32
    return %c0_i32, %c0_i32_0 : i32, i32
  }
}

</mosaic_0001>

<bundles_post_ra>
// kernel: forward.6
= control target key start
LH: loop header
LB: loop body
LE: loop exit
PB: predicated region body
PF: predicated region fallthrough
CT: control target
= control target key end

     0   :  { %vm154_vm0 = vcmask 1044480   ;;  %vm155_vm1 = vcmask 1045504   ;;  %v1520_v0 = vmov 0.0   ;;  %v1521_v2 = vmov 65535   ;;  %s2071_s4 = inlined_call_operand.vmem [shape: bf16[27,8], index: 4, kind: input, shape index: {}]   ;;  %s2072_s0 = inlined_call_operand.vmem [shape: bf16[162,27], index: 0, kind: input, shape index: {}]   ;;  %s2073_s1 = inlined_call_operand.vmem [shape: bf16[162,27], index: 1, kind: input, shape index: {}]   ;;  %s2074_s2 = inlined_call_operand.vmem [shape: bf16[162,27], index: 2, kind: input, shape index: {}]   ;;  %s2075_s3 = inlined_call_operand.vmem [shape: bf16[162,27], index: 3, kind: input, shape index: {}]   ;;  %s2076_s5 = inlined_call_operand.vmem [shape: f32[1,8], index: 5, kind: input, shape index: {}]   ;;  %s2077_s6 = inlined_call_operand.vmem [shape: f32[162,8], index: 6, kind: output, shape index: {}]  }
   0x1   :  { %1279 = vmatprep.subr.bf16.mxu0 %v1520_v0  ;;  %1327 = vmatprep.subr.bf16.mxu1 %v1520_v0  ;;  %v1474_v1 = vld [vmem:[%s2071_s4 + $0x8] sm:$0x3f]   ;;  %v156_v3 = vsel %vm154_vm0, 4294967295, %v1521_v2  ;;  %vm1522_vm2 = vmmov 0   ;;  %v1475_v6 = vld [vmem:[%s2071_s4] sm:$0xff]   ;;  %vm120_vm3 = vcmask 220160  }
   0x2   :  { %v157_v4 = vsel %vm155_vm1, %v156_v3, 0  ;;  %1283 = vmatprep.mubr.msk.bf16.mxu0 %vm1522_vm2, %v1520_v0  ;;  %1331 = vmatprep.mubr.msk.bf16.mxu1 %vm1522_vm2, %v1520_v0  ;;  %v1476_v7 = vld [vmem:[%s2072_s0] sm:$0xff]   ;;  %v1478_v9 = vld [vmem:[%s2072_s0 + $0x8] sm:$0xff]   ;;  %v1480_v11 = vld [vmem:[%s2072_s0 + $0x10] sm:$0xff]   ;;  %vm1109_vm4 = vcmask 64512   ;;  %vm1130_vm5 = vcmask 58368  }
   0x3   :  { %v159_v5 = vand.u32 %v1474_v1, %v157_v4  ;;  %v1477_v8 = vld [vmem:[%s2073_s1] sm:$0xff]   ;;  %v1479_v10 = vld [vmem:[%s2073_s1 + $0x8] sm:$0xff]   ;;  %v1481_v12 = vld [vmem:[%s2073_s1 + $0x10] sm:$0xff]  }
   0x4   :  { %v1482_v13 = vld [vmem:[%s2072_s0 + $0x18] sm:$0xff]   ;;  %v1484_v15 = vld [vmem:[%s2072_s0 + $0x20] sm:$0xff]   ;;  %v1486_v17 = vld [vmem:[%s2072_s0 + $0x28] sm:$0xff]  }
   0x5   :  { %1280 = vmatpush3.bf16.msra.mxu0 %v159_v5  ;;  %1328 = vmatpush3.bf16.msra.mxu1 %v159_v5  ;;  %v1483_v14 = vld [vmem:[%s2073_s1 + $0x18] sm:$0xff]   ;;  %v1485_v16 = vld [vmem:[%s2073_s1 + $0x20] sm:$0xff]   ;;  %v1487_v18 = vld [vmem:[%s2073_s1 + $0x28] sm:$0xff]  }
   0x6   :  { %1281 = vmatprep.subr.bf16.mxu0 %v1520_v0  ;;  %1329 = vmatprep.subr.bf16.mxu1 %v1520_v0  ;;  %v1488_v19 = vld [vmem:[%s2072_s0 + $0x30] sm:$0xff]   ;;  %v1490_v21 = vld [vmem:[%s2072_s0 + $0x38] sm:$0xff]   ;;  %v1492_v23 = vld [vmem:[%s2072_s0 + $0x40] sm:$0xff]  }
   0x7   :  { %v1489_v20 = vld [vmem:[%s2073_s1 + $0x30] sm:$0xff]   ;;  %v1491_v22 = vld [vmem:[%s2073_s1 + $0x38] sm:$0xff]   ;;  %v1493_v24 = vld [vmem:[%s2073_s1 + $0x40] sm:$0xff]  }
   0x8   :  { %v1494_v25 = vld [vmem:[%s2072_s0 + $0x48] sm:$0xff]   ;;  %v1496_v27 = vld [vmem:[%s2072_s0 + $0x50] ss:$0 sps:$4 sm:$0x11]   ;;  %v1498_v29 = vld [vmem:[%s2074_s2] sm:$0xff]  }
   0x9   :  { %1282 = vmatpush3.bf16.msra.mxu0 %v1475_v6  ;;  %1330 = vmatpush3.bf16.msra.mxu1 %v1475_v6  ;;  %v1495_v26 = vld [vmem:[%s2073_s1 + $0x48] sm:$0xff]   ;;  %v1497_v28 = vld [vmem:[%s2073_s1 + $0x50] ss:$0 sps:$4 sm:$0x11]   ;;  %v1499_v30 = vld [vmem:[%s2075_s3] sm:$0xff]  }
   0xa   :  { %1375 = vmatprep.subr.bf16.mxu0 %v1520_v0  ;;  %1423 = vmatprep.subr.bf16.mxu1 %v1520_v0  ;;  %v1500_v31 = vld [vmem:[%s2074_s2 + $0x8] sm:$0xff]   ;;  %v1502_v33 = vld [vmem:[%s2074_s2 + $0x10] sm:$0xff]   ;;  %v1504_v35 = vld [vmem:[%s2074_s2 + $0x18] sm:$0xff]  }
   0xb   :  { %v1501_v32 = vld [vmem:[%s2075_s3 + $0x8] sm:$0xff]   ;;  %v1503_v34 = vld [vmem:[%s2075_s3 + $0x10] sm:$0xff]   ;;  %v1505_v36 = vld [vmem:[%s2075_s3 + $0x18] sm:$0xff]  }
   0xc   :  { %1284 = vmatmul.mubr.msk.bf16.vlgmr.msra.gmra.mxu0 %vm120_vm3, %v1476_v7  ;;  %1332 = vmatmul.mubr.msk.bf16.vlgmr.msra.gmra.mxu1 %vm120_vm3, %v1477_v8  ;;  %v1506_v37 = vld [vmem:[%s2074_s2 + $0x20] sm:$0xff]   ;;  %v1508_v39 = vld [vmem:[%s2074_s2 + $0x28] sm:$0xff]   ;;  %v1510_v41 = vld [vmem:[%s2074_s2 + $0x30] sm:$0xff]  }
   0xd   :  { %1376 = vmatpush3.bf16.msra.mxu0 %v159_v5  ;;  %1424 = vmatpush3.bf16.msra.mxu1 %v159_v5  ;;  %v1507_v38 = vld [vmem:[%s2075_s3 + $0x20] sm:$0xff]   ;;  %v1509_v40 = vld [vmem:[%s2075_s3 + $0x28] sm:$0xff]   ;;  %v1511_v42 = vld [vmem:[%s2075_s3 + $0x30] sm:$0xff]  }
   0xe   :  { %1287 = vmatprep.mubr.msk.bf16.mxu0 %vm1522_vm2, %v1520_v0  ;;  %1335 = vmatprep.mubr.msk.bf16.mxu1 %vm1522_vm2, %v1520_v0  ;;  %v1512_v43 = vld [vmem:[%s2074_s2 + $0x38] sm:$0xff]   ;;  %v1514_v45 = vld [vmem:[%s2074_s2 + $0x40] sm:$0xff]   ;;  %v1516_v47 = vld [vmem:[%s2074_s2 + $0x48] sm:$0xff]  }
   0xf   :  { %1377 = vmatprep.subr.bf16.mxu0 %v1520_v0  ;;  %1425 = vmatprep.subr.bf16.mxu1 %v1520_v0  ;;  %v1513_v44 = vld [vmem:[%s2075_s3 + $0x38] sm:$0xff]   ;;  %v1515_v46 = vld [vmem:[%s2075_s3 + $0x40] sm:$0xff]   ;;  %v1517_v48 = vld [vmem:[%s2075_s3 + $0x48] sm:$0xff]  }
  0x10   :  { %v1518_v49 = vld [vmem:[%s2074_s2 + $0x50] ss:$0 sps:$4 sm:$0x11]   ;;  %v1839_v51 = vld [vmem:[%s2076_s5] ss:$0 sm:$0xff] }
  0x11   :  { %1378 = vmatpush3.bf16.msra.mxu0 %v1475_v6  ;;  %1426 = vmatpush3.bf16.msra.mxu1 %v1475_v6  ;;  %v1519_v50 = vld [vmem:[%s2075_s3 + $0x50] ss:$0 sps:$4 sm:$0x11]  }
  0x14   :  { %1288 = vmatmul.mubr.msk.bf16.gmra.mxu0 %vm120_vm3, %v1478_v9  ;;  %1336 = vmatmul.mubr.msk.bf16.gmra.mxu1 %vm120_vm3, %v1479_v10 }
  0x15   :  { %1291 = vmatprep.mubr.msk.bf16.mxu0 %vm1522_vm2, %v1520_v0  ;;  %1339 = vmatprep.mubr.msk.bf16.mxu1 %vm1522_vm2, %v1520_v0 }
  0x1c   :  { %1292 = vmatmul.mubr.msk.bf16.gmra.mxu0 %vm120_vm3, %v1480_v11  ;;  %1340 = vmatmul.mubr.msk.bf16.gmra.mxu1 %vm120_vm3, %v1481_v12 }
  0x1d   :  { %1295 = vmatprep.mubr.msk.bf16.mxu0 %vm1522_vm2, %v1520_v0  ;;  %1343 = vmatprep.mubr.msk.bf16.mxu1 %vm1522_vm2, %v1520_v0 }
  0x24   :  { %1296 = vmatmul.mubr.msk.bf16.gmra.mxu0 %vm120_vm3, %v1482_v13  ;;  %1344 = vmatmul.mubr.msk.bf16.gmra.mxu1 %vm120_vm3, %v1483_v14 }
  0x25   :  { %1299 = vmatprep.mubr.msk.bf16.mxu0 %vm1522_vm2, %v1520_v0  ;;  %1347 = vmatprep.mubr.msk.bf16.mxu1 %vm1522_vm2, %v1520_v0 }
  0x2c   :  { %1300 = vmatmul.mubr.msk.bf16.gmra.mxu0 %vm120_vm3, %v1484_v15  ;;  %1348 = vmatmul.mubr.msk.bf16.gmra.mxu1 %vm120_vm3, %v1485_v16 }
  0x2d   :  { %1303 = vmatprep.mubr.msk.bf16.mxu0 %vm1522_vm2, %v1520_v0  ;;  %1351 = vmatprep.mubr.msk.bf16.mxu1 %vm1522_vm2, %v1520_v0 }
  0x34   :  { %1304 = vmatmul.mubr.msk.bf16.gmra.mxu0 %vm120_vm3, %v1486_v17  ;;  %1352 = vmatmul.mubr.msk.bf16.gmra.mxu1 %vm120_vm3, %v1487_v18 }
  0x35   :  { %1307 = vmatprep.mubr.msk.bf16.mxu0 %vm1522_vm2, %v1520_v0  ;;  %1355 = vmatprep.mubr.msk.bf16.mxu1 %vm1522_vm2, %v1520_v0 }
  0x3c   :  { %1308 = vmatmul.mubr.msk.bf16.gmra.mxu0 %vm120_vm3, %v1488_v19  ;;  %1356 = vmatmul.mubr.msk.bf16.gmra.mxu1 %vm120_vm3, %v1489_v20 }
  0x3d   :  { %1311 = vmatprep.mubr.msk.bf16.mxu0 %vm1522_vm2, %v1520_v0  ;;  %1359 = vmatprep.mubr.msk.bf16.mxu1 %vm1522_vm2, %v1520_v0 }
  0x44   :  { %1312 = vmatmul.mubr.msk.bf16.gmra.mxu0 %vm120_vm3, %v1490_v21  ;;  %1360 = vmatmul.mubr.msk.bf16.gmra.mxu1 %vm120_vm3, %v1491_v22 }
  0x45   :  { %1315 = vmatprep.mubr.msk.bf16.mxu0 %vm1522_vm2, %v1520_v0  ;;  %1363 = vmatprep.mubr.msk.bf16.mxu1 %vm1522_vm2, %v1520_v0 }
  0x4c   :  { %1316 = vmatmul.mubr.msk.bf16.gmra.mxu0 %vm120_vm3, %v1492_v23  ;;  %1364 = vmatmul.mubr.msk.bf16.gmra.mxu1 %vm120_vm3, %v1493_v24 }
  0x4d   :  { %1319 = vmatprep.mubr.msk.bf16.mxu0 %vm1522_vm2, %v1520_v0  ;;  %1367 = vmatprep.mubr.msk.bf16.mxu1 %vm1522_vm2, %v1520_v0 }
  0x54   :  { %1320 = vmatmul.mubr.msk.bf16.gmra.mxu0 %vm120_vm3, %v1494_v25  ;;  %1368 = vmatmul.mubr.msk.bf16.gmra.mxu1 %vm120_vm3, %v1495_v26 }
  0x55   :  { %1323 = vmatprep.mubr.msk.bf16.mxu0 %vm1522_vm2, %v1520_v0  ;;  %1371 = vmatprep.mubr.msk.bf16.mxu1 %vm1522_vm2, %v1520_v0 }
  0x5c   :  { %1324 = vmatmul.mubr.msk.bf16.gmra.mxu0 %vm120_vm3, %v1496_v27  ;;  %1372 = vmatmul.mubr.msk.bf16.gmra.mxu1 %vm120_vm3, %v1497_v28 }
  0x5d   :  { %1379 = vmatprep.mubr.msk.bf16.mxu0 %vm1522_vm2, %v1520_v0  ;;  %1427 = vmatprep.mubr.msk.bf16.mxu1 %vm1522_vm2, %v1520_v0 }
  0x64   :  { %1380 = vmatmul.mubr.msk.bf16.vlgmr.msra.gmra.mxu0 %vm120_vm3, %v1498_v29  ;;  %1428 = vmatmul.mubr.msk.bf16.vlgmr.msra.gmra.mxu1 %vm120_vm3, %v1499_v30 }
  0x65   :  { %1383 = vmatprep.mubr.msk.bf16.mxu0 %vm1522_vm2, %v1520_v0  ;;  %1431 = vmatprep.mubr.msk.bf16.mxu1 %vm1522_vm2, %v1520_v0 }
  0x6c   :  { %1384 = vmatmul.mubr.msk.bf16.gmra.mxu0 %vm120_vm3, %v1500_v31  ;;  %1432 = vmatmul.mubr.msk.bf16.gmra.mxu1 %vm120_vm3, %v1501_v32 }
  0x6d   :  { %1387 = vmatprep.mubr.msk.bf16.mxu0 %vm1522_vm2, %v1520_v0  ;;  %1435 = vmatprep.mubr.msk.bf16.mxu1 %vm1522_vm2, %v1520_v0 }
  0x74   :  { %1388 = vmatmul.mubr.msk.bf16.gmra.mxu0 %vm120_vm3, %v1502_v33  ;;  %1436 = vmatmul.mubr.msk.bf16.gmra.mxu1 %vm120_vm3, %v1503_v34 }
  0x75   :  { %1391 = vmatprep.mubr.msk.bf16.mxu0 %vm1522_vm2, %v1520_v0  ;;  %1439 = vmatprep.mubr.msk.bf16.mxu1 %vm1522_vm2, %v1520_v0 }
  0x7c   :  { %1392 = vmatmul.mubr.msk.bf16.gmra.mxu0 %vm120_vm3, %v1504_v35  ;;  %1440 = vmatmul.mubr.msk.bf16.gmra.mxu1 %vm120_vm3, %v1505_v36 }
  0x7d   :  { %1395 = vmatprep.mubr.msk.bf16.mxu0 %vm1522_vm2, %v1520_v0  ;;  %1443 = vmatprep.mubr.msk.bf16.mxu1 %vm1522_vm2, %v1520_v0 }
  0x84   :  { %1396 = vmatmul.mubr.msk.bf16.gmra.mxu0 %vm120_vm3, %v1506_v37  ;;  %1444 = vmatmul.mubr.msk.bf16.gmra.mxu1 %vm120_vm3, %v1507_v38 }
  0x85   :  { %1399 = vmatprep.mubr.msk.bf16.mxu0 %vm1522_vm2, %v1520_v0  ;;  %1447 = vmatprep.mubr.msk.bf16.mxu1 %vm1522_vm2, %v1520_v0 }
  0x8c   :  { %1400 = vmatmul.mubr.msk.bf16.gmra.mxu0 %vm120_vm3, %v1508_v39  ;;  %1448 = vmatmul.mubr.msk.bf16.gmra.mxu1 %vm120_vm3, %v1509_v40 }
  0x8d   :  { %1403 = vmatprep.mubr.msk.bf16.mxu0 %vm1522_vm2, %v1520_v0  ;;  %1451 = vmatprep.mubr.msk.bf16.mxu1 %vm1522_vm2, %v1520_v0 }
  0x94   :  { %1404 = vmatmul.mubr.msk.bf16.gmra.mxu0 %vm120_vm3, %v1510_v41  ;;  %1452 = vmatmul.mubr.msk.bf16.gmra.mxu1 %vm120_vm3, %v1511_v42 }
  0x95   :  { %1407 = vmatprep.mubr.msk.bf16.mxu0 %vm1522_vm2, %v1520_v0  ;;  %1455 = vmatprep.mubr.msk.bf16.mxu1 %vm1522_vm2, %v1520_v0 }
  0x9c   :  { %1408 = vmatmul.mubr.msk.bf16.gmra.mxu0 %vm120_vm3, %v1512_v43  ;;  %1456 = vmatmul.mubr.msk.bf16.gmra.mxu1 %vm120_vm3, %v1513_v44 }
  0x9d   :  { %1411 = vmatprep.mubr.msk.bf16.mxu0 %vm1522_vm2, %v1520_v0  ;;  %1459 = vmatprep.mubr.msk.bf16.mxu1 %vm1522_vm2, %v1520_v0 }
  0xa4   :  { %1412 = vmatmul.mubr.msk.bf16.gmra.mxu0 %vm120_vm3, %v1514_v45  ;;  %1460 = vmatmul.mubr.msk.bf16.gmra.mxu1 %vm120_vm3, %v1515_v46 }
  0xa5   :  { %1415 = vmatprep.mubr.msk.bf16.mxu0 %vm1522_vm2, %v1520_v0  ;;  %1463 = vmatprep.mubr.msk.bf16.mxu1 %vm1522_vm2, %v1520_v0 }
  0xac   :  { %1416 = vmatmul.mubr.msk.bf16.gmra.mxu0 %vm120_vm3, %v1516_v47  ;;  %1464 = vmatmul.mubr.msk.bf16.gmra.mxu1 %vm120_vm3, %v1517_v48 }
  0xad   :  { %1419 = vmatprep.mubr.msk.bf16.mxu0 %vm1522_vm2, %v1520_v0  ;;  %1467 = vmatprep.mubr.msk.bf16.mxu1 %vm1522_vm2, %v1520_v0 }
  0xb4   :  { %1420 = vmatmul.mubr.msk.bf16.gmra.mxu0 %vm120_vm3, %v1518_v49  ;;  %1468 = vmatmul.mubr.msk.bf16.gmra.mxu1 %vm120_vm3, %v1519_v50 }
  0xcc   :  { %v195_v52 = vpop.f32.mrf.mxu0  ;;  %v443_v53 = vpop.f32.mrf.mxu1 }
  0xcd   :  { %v196_v54 = vadd.f32 %v1839_v51, %v195_v52  ;;  %v444_v55 = vadd.f32 %v1839_v51, %v443_v53 }
  0xce   :  { %v1285_v56 = vpop.f32.mrf.mxu0  ;;  %v1333_v57 = vpop.f32.mrf.mxu1 }
  0xcf   :  { %v281_v58 = vmax.f32 %v196_v54, 0.0  ;;  %v529_v59 = vmax.f32 %v444_v55, 0.0 }
  0xd0   :  { %v198_v60 = vpop.f32.mrf.mxu0  ;;  %v446_v61 = vpop.f32.mrf.mxu1 }
  0xd1   :  { %v1843_v62 = vmax.f32 %v281_v58, %v529_v59  ;;  %v199_v63 = vadd.f32 %v1839_v51, %v198_v60  ;;  %v447_v0 = vadd.f32 %v1839_v51, %v446_v61 }
  0xd2   :  { %v1286_v1 = vpop.f32.mrf.mxu0  ;;  %v1334_v2 = vpop.f32.mrf.mxu1 }
  0xd3   :  { %v282_v3 = vmax.f32 %v199_v63, 0.0  ;;  %v530_v4 = vmax.f32 %v447_v0, 0.0 }
  0xd4   :  { %v203_v5 = vpop.f32.mrf.mxu0  ;;  %v451_v6 = vpop.f32.mrf.mxu1 }
  0xd5   :  { %v1847_v7 = vmax.f32 %v282_v3, %v530_v4  ;;  %v204_v8 = vadd.f32 %v1839_v51, %v203_v5  ;;  %v452_v9 = vadd.f32 %v1839_v51, %v451_v6 }
  0xd6   :  { %v1289_v10 = vpop.f32.mrf.mxu0  ;;  %v1337_v11 = vpop.f32.mrf.mxu1 }
  0xd7   :  { %v283_v12 = vmax.f32 %v204_v8, 0.0  ;;  %v531_v13 = vmax.f32 %v452_v9, 0.0 }
  0xd8   :  { %v206_v14 = vpop.f32.mrf.mxu0  ;;  %v454_v15 = vpop.f32.mrf.mxu1 }
  0xd9   :  { %v1851_v16 = vmax.f32 %v283_v12, %v531_v13  ;;  %v207_v17 = vadd.f32 %v1839_v51, %v206_v14  ;;  %v455_v18 = vadd.f32 %v1839_v51, %v454_v15 }
  0xda   :  { %v1290_v19 = vpop.f32.mrf.mxu0  ;;  %v1338_v20 = vpop.f32.mrf.mxu1 }
  0xdb   :  { %v284_v21 = vmax.f32 %v207_v17, 0.0  ;;  %v532_v22 = vmax.f32 %v455_v18, 0.0 }
  0xdc   :  { %v211_v23 = vpop.f32.mrf.mxu0  ;;  %v459_v24 = vpop.f32.mrf.mxu1 }
  0xdd   :  { %v1855_v25 = vmax.f32 %v284_v21, %v532_v22  ;;  %v212_v26 = vadd.f32 %v1839_v51, %v211_v23  ;;  %v460_v27 = vadd.f32 %v1839_v51, %v459_v24 }
  0xde   :  { %v1293_v28 = vpop.f32.mrf.mxu0  ;;  %v1341_v29 = vpop.f32.mrf.mxu1 }
  0xdf   :  { %v285_v30 = vmax.f32 %v212_v26, 0.0  ;;  %v533_v31 = vmax.f32 %v460_v27, 0.0 }
  0xe0   :  { %v214_v32 = vpop.f32.mrf.mxu0  ;;  %v462_v33 = vpop.f32.mrf.mxu1 }
  0xe1   :  { %v1859_v34 = vmax.f32 %v285_v30, %v533_v31  ;;  %v215_v35 = vadd.f32 %v1839_v51, %v214_v32  ;;  %v463_v36 = vadd.f32 %v1839_v51, %v462_v33 }
  0xe2   :  { %v1294_v37 = vpop.f32.mrf.mxu0  ;;  %v1342_v38 = vpop.f32.mrf.mxu1 }
  0xe3   :  { %v286_v39 = vmax.f32 %v215_v35, 0.0  ;;  %v534_v40 = vmax.f32 %v463_v36, 0.0 }
  0xe4   :  { %v219_v41 = vpop.f32.mrf.mxu0  ;;  %v467_v42 = vpop.f32.mrf.mxu1 }
  0xe5   :  { %v1863_v43 = vmax.f32 %v286_v39, %v534_v40  ;;  %v220_v44 = vadd.f32 %v1839_v51, %v219_v41  ;;  %v468_v45 = vadd.f32 %v1839_v51, %v467_v42 }
  0xe6   :  { %v1297_v46 = vpop.f32.mrf.mxu0  ;;  %v1345_v47 = vpop.f32.mrf.mxu1 }
  0xe7   :  { %v287_v48 = vmax.f32 %v220_v44, 0.0  ;;  %v535_v49 = vmax.f32 %v468_v45, 0.0 }
  0xe8   :  { %v222_v50 = vpop.f32.mrf.mxu0  ;;  %v470_v52 = vpop.f32.mrf.mxu1 }
  0xe9   :  { %v1867_v53 = vmax.f32 %v287_v48, %v535_v49  ;;  %v223_v54 = vadd.f32 %v1839_v51, %v222_v50  ;;  %v471_v55 = vadd.f32 %v1839_v51, %v470_v52 }
  0xea   :  { %v1298_v56 = vpop.f32.mrf.mxu0  ;;  %v1346_v57 = vpop.f32.mrf.mxu1 }
  0xeb   :  { %v288_v58 = vmax.f32 %v223_v54, 0.0  ;;  %v536_v59 = vmax.f32 %v471_v55, 0.0 }
  0xec   :  { %v227_v60 = vpop.f32.mrf.mxu0  ;;  %v475_v61 = vpop.f32.mrf.mxu1 }
  0xed   :  { %v1871_v63 = vmax.f32 %v288_v58, %v536_v59  ;;  %v228_v0 = vadd.f32 %v1839_v51, %v227_v60  ;;  %v476_v1 = vadd.f32 %v1839_v51, %v475_v61 }
  0xee   :  { %v1301_v2 = vpop.f32.mrf.mxu0  ;;  %v1349_v3 = vpop.f32.mrf.mxu1 }
  0xef   :  { %v289_v4 = vmax.f32 %v228_v0, 0.0  ;;  %v537_v5 = vmax.f32 %v476_v1, 0.0 }
  0xf0   :  { %v230_v6 = vpop.f32.mrf.mxu0  ;;  %v478_v8 = vpop.f32.mrf.mxu1 }
  0xf1   :  { %v1875_v9 = vmax.f32 %v289_v4, %v537_v5  ;;  %v231_v10 = vadd.f32 %v1839_v51, %v230_v6  ;;  %v479_v11 = vadd.f32 %v1839_v51, %v478_v8 }
  0xf2   :  { %v1302_v12 = vpop.f32.mrf.mxu0  ;;  %v1350_v13 = vpop.f32.mrf.mxu1 }
  0xf3   :  { %v290_v14 = vmax.f32 %v231_v10, 0.0  ;;  %v538_v15 = vmax.f32 %v479_v11, 0.0 }
  0xf4   :  { %v235_v17 = vpop.f32.mrf.mxu0  ;;  %v483_v18 = vpop.f32.mrf.mxu1 }
  0xf5   :  { %v1879_v19 = vmax.f32 %v290_v14, %v538_v15  ;;  %v236_v20 = vadd.f32 %v1839_v51, %v235_v17  ;;  %v484_v21 = vadd.f32 %v1839_v51, %v483_v18 }
  0xf6   :  { %v1305_v22 = vpop.f32.mrf.mxu0  ;;  %v1353_v23 = vpop.f32.mrf.mxu1 }
  0xf7   :  { %v291_v24 = vmax.f32 %v236_v20, 0.0  ;;  %v539_v26 = vmax.f32 %v484_v21, 0.0 }
  0xf8   :  { %v238_v27 = vpop.f32.mrf.mxu0  ;;  %v486_v28 = vpop.f32.mrf.mxu1 }
  0xf9   :  { %v1883_v29 = vmax.f32 %v291_v24, %v539_v26  ;;  %v239_v30 = vadd.f32 %v1839_v51, %v238_v27  ;;  %v487_v31 = vadd.f32 %v1839_v51, %v486_v28 }
  0xfa   :  { %v1306_v32 = vpop.f32.mrf.mxu0  ;;  %v1354_v33 = vpop.f32.mrf.mxu1 }
  0xfb   :  { %v292_v35 = vmax.f32 %v239_v30, 0.0  ;;  %v540_v36 = vmax.f32 %v487_v31, 0.0 }
  0xfc   :  { %v243_v37 = vpop.f32.mrf.mxu0  ;;  %v491_v38 = vpop.f32.mrf.mxu1 }
  0xfd   :  { %v1887_v39 = vmax.f32 %v292_v35, %v540_v36  ;;  %v244_v40 = vadd.f32 %v1839_v51, %v243_v37  ;;  %v492_v41 = vadd.f32 %v1839_v51, %v491_v38 }
  0xfe   :  { %v1309_v42 = vpop.f32.mrf.mxu0  ;;  %v1357_v44 = vpop.f32.mrf.mxu1 }
  0xff   :  { %v293_v45 = vmax.f32 %v244_v40, 0.0  ;;  %v541_v46 = vmax.f32 %v492_v41, 0.0 }
 0x100   :  { %v246_v47 = vpop.f32.mrf.mxu0  ;;  %v494_v48 = vpop.f32.mrf.mxu1 }
 0x101   :  { %v1891_v49 = vmax.f32 %v293_v45, %v541_v46  ;;  %v247_v50 = vadd.f32 %v1839_v51, %v246_v47  ;;  %v495_v52 = vadd.f32 %v1839_v51, %v494_v48 }
 0x102   :  { %v1310_v54 = vpop.f32.mrf.mxu0  ;;  %v1358_v55 = vpop.f32.mrf.mxu1 }
 0x103   :  { %v294_v56 = vmax.f32 %v247_v50, 0.0  ;;  %v542_v57 = vmax.f32 %v495_v52, 0.0 }
 0x104   :  { %v251_v58 = vpop.f32.mrf.mxu0  ;;  %v499_v59 = vpop.f32.mrf.mxu1 }
 0x105   :  { %v1895_v60 = vmax.f32 %v294_v56, %v542_v57  ;;  %v252_v61 = vadd.f32 %v1839_v51, %v251_v58  ;;  %v500_v0 = vadd.f32 %v1839_v51, %v499_v59 }
 0x106   :  { %v1313_v1 = vpop.f32.mrf.mxu0  ;;  %v1361_v2 = vpop.f32.mrf.mxu1 }
 0x107   :  { %v295_v3 = vmax.f32 %v252_v61, 0.0  ;;  %v543_v4 = vmax.f32 %v500_v0, 0.0 }
 0x108   :  { %v254_v5 = vpop.f32.mrf.mxu0  ;;  %v502_v6 = vpop.f32.mrf.mxu1 }
 0x109   :  { %v1899_v8 = vmax.f32 %v295_v3, %v543_v4  ;;  %v255_v10 = vadd.f32 %v1839_v51, %v254_v5  ;;  %v503_v11 = vadd.f32 %v1839_v51, %v502_v6 }
 0x10a   :  { %v1314_v12 = vpop.f32.mrf.mxu0  ;;  %v1362_v13 = vpop.f32.mrf.mxu1 }
 0x10b   :  { %v296_v14 = vmax.f32 %v255_v10, 0.0  ;;  %v544_v15 = vmax.f32 %v503_v11, 0.0 }
 0x10c   :  { %v259_v17 = vpop.f32.mrf.mxu0  ;;  %v507_v18 = vpop.f32.mrf.mxu1 }
 0x10d   :  { %v1903_v20 = vmax.f32 %v296_v14, %v544_v15  ;;  %v260_v21 = vadd.f32 %v1839_v51, %v259_v17  ;;  %v508_v22 = vadd.f32 %v1839_v51, %v507_v18 }
 0x10e   :  { %v1317_v23 = vpop.f32.mrf.mxu0  ;;  %v1365_v24 = vpop.f32.mrf.mxu1 }
 0x10f   :  { %v297_v26 = vmax.f32 %v260_v21, 0.0  ;;  %v545_v27 = vmax.f32 %v508_v22, 0.0 }
 0x110   :  { %v262_v28 = vpop.f32.mrf.mxu0  ;;  %v510_v30 = vpop.f32.mrf.mxu1 }
 0x111   :  { %v1907_v31 = vmax.f32 %v297_v26, %v545_v27  ;;  %v263_v32 = vadd.f32 %v1839_v51, %v262_v28  ;;  %v511_v33 = vadd.f32 %v1839_v51, %v510_v30 }
 0x112   :  { %v1318_v35 = vpop.f32.mrf.mxu0  ;;  %v1366_v36 = vpop.f32.mrf.mxu1 }
 0x113   :  { %v298_v37 = vmax.f32 %v263_v32, 0.0  ;;  %v546_v38 = vmax.f32 %v511_v33, 0.0 }
 0x114   :  { %v267_v40 = vpop.f32.mrf.mxu0  ;;  %v515_v41 = vpop.f32.mrf.mxu1 }
 0x115   :  { %v1911_v42 = vmax.f32 %v298_v37, %v546_v38  ;;  %v268_v44 = vadd.f32 %v1839_v51, %v267_v40  ;;  %v516_v45 = vadd.f32 %v1839_v51, %v515_v41 }
 0x116   :  { %v1321_v46 = vpop.f32.mrf.mxu0  ;;  %v1369_v47 = vpop.f32.mrf.mxu1 }
 0x117   :  { %v299_v48 = vmax.f32 %v268_v44, 0.0  ;;  %v547_v50 = vmax.f32 %v516_v45, 0.0 }
 0x118   :  { %v270_v52 = vpop.f32.mrf.mxu0  ;;  %v518_v54 = vpop.f32.mrf.mxu1 }
 0x119   :  { %v1915_v55 = vmax.f32 %v299_v48, %v547_v50  ;;  %v271_v56 = vadd.f32 %v1839_v51, %v270_v52  ;;  %v519_v57 = vadd.f32 %v1839_v51, %v518_v54 }
 0x11a   :  { %v1322_v58 = vpop.f32.mrf.mxu0  ;;  %v1370_v59 = vpop.f32.mrf.mxu1 }
 0x11b   :  { %v300_v61 = vmax.f32 %v271_v56, 0.0  ;;  %v548_v0 = vmax.f32 %v519_v57, 0.0 }
 0x11c   :  { %v275_v1 = vpop.f32.mrf.mxu0  ;;  %v523_v2 = vpop.f32.mrf.mxu1 }
 0x11d   :  { %v1919_v3 = vmax.f32 %v300_v61, %v548_v0  ;;  %v276_v4 = vadd.f32 %v1839_v51, %v275_v1  ;;  %v524_v5 = vadd.f32 %v1839_v51, %v523_v2 }
 0x11e   :  { %v1325_v6 = vpop.f32.mrf.mxu0  ;;  %v1373_v10 = vpop.f32.mrf.mxu1 }
 0x11f   :  { %v301_v11 = vmax.f32 %v276_v4, 0.0  ;;  %v549_v12 = vmax.f32 %v524_v5, 0.0 }
 0x120   :  { %v278_v13 = vpop.f32.mrf.mxu0  ;;  %v526_v14 = vpop.f32.mrf.mxu1 }
 0x121   :  { %v1923_v15 = vmax.f32 %v301_v11, %v549_v12 }
 0x122   :  { %v1326_v17 = vpop.f32.mrf.mxu0  ;;  %v1374_v18 = vpop.f32.mrf.mxu1 }
 0x124   :  { %v712_v21 = vpop.f32.mrf.mxu0  ;;  %v960_v22 = vpop.f32.mrf.mxu1 }
 0x125   :  { %v713_v23 = vadd.f32 %v1839_v51, %v712_v21  ;;  %v961_v24 = vadd.f32 %v1839_v51, %v960_v22 }
 0x126   :  { %v1381_v26 = vpop.f32.mrf.mxu0  ;;  %v1429_v27 = vpop.f32.mrf.mxu1 }
 0x127   :  { %v798_v28 = vmax.f32 %v713_v23, 0.0  ;;  %v1046_v30 = vmax.f32 %v961_v24, 0.0 }
 0x128   :  { %v715_v32 = vpop.f32.mrf.mxu0  ;;  %v963_v33 = vpop.f32.mrf.mxu1 }
 0x129   :  { %v1067_v35 = vmax.f32 %v798_v28, %v1046_v30  ;;  %v716_v36 = vadd.f32 %v1839_v51, %v715_v32  ;;  %v964_v37 = vadd.f32 %v1839_v51, %v963_v33 }
 0x12a   :  { %v1382_v38 = vpop.f32.mrf.mxu0  ;;  %v1430_v40 = vpop.f32.mrf.mxu1 }
 0x12b   :  { %v1088_v41 = vmax.f32 %v1843_v62, %v1067_v35  ;;  %v799_v44 = vmax.f32 %v716_v36, 0.0  ;;  %v1047_v45 = vmax.f32 %v964_v37, 0.0 }
 0x12c   :  { %v720_v46 = vpop.f32.mrf.mxu0  ;;  %v968_v47 = vpop.f32.mrf.mxu1 }
 0x12d   :  { %1110 = vst.msk [vmem:[%s2077_s6] sm:$0xff] %vm1109_vm4, %v1088_v41  ;;  %v1068_v48 = vmax.f32 %v799_v44, %v1047_v45  ;;  %v721_v50 = vadd.f32 %v1839_v51, %v720_v46  ;;  %v969_v52 = vadd.f32 %v1839_v51, %v968_v47 }
 0x12e   :  { %v1385_v54 = vpop.f32.mrf.mxu0  ;;  %v1433_v56 = vpop.f32.mrf.mxu1 }
 0x12f   :  { %v1089_v57 = vmax.f32 %v1847_v7, %v1068_v48  ;;  %v800_v58 = vmax.f32 %v721_v50, 0.0  ;;  %v1048_v62 = vmax.f32 %v969_v52, 0.0 }
 0x130   :  { %v723_v59 = vpop.f32.mrf.mxu0  ;;  %v971_v61 = vpop.f32.mrf.mxu1 }
 0x131   :  { %1111 = vst.msk [vmem:[%s2077_s6 + $0x8] sm:$0xff] %vm1109_vm4, %v1089_v57  ;;  %v1069_v0 = vmax.f32 %v800_v58, %v1048_v62  ;;  %v724_v1 = vadd.f32 %v1839_v51, %v723_v59  ;;  %v972_v2 = vadd.f32 %v1839_v51, %v971_v61 }
 0x132   :  { %v1386_v4 = vpop.f32.mrf.mxu0  ;;  %v1434_v5 = vpop.f32.mrf.mxu1 }
 0x133   :  { %v1090_v6 = vmax.f32 %v1851_v16, %v1069_v0  ;;  %v801_v10 = vmax.f32 %v724_v1, 0.0  ;;  %v1049_v7 = vmax.f32 %v972_v2, 0.0 }
 0x134   :  { %v728_v11 = vpop.f32.mrf.mxu0  ;;  %v976_v12 = vpop.f32.mrf.mxu1 }
 0x135   :  { %1112 = vst.msk [vmem:[%s2077_s6 + $0x10] sm:$0xff] %vm1109_vm4, %v1090_v6  ;;  %v1070_v13 = vmax.f32 %v801_v10, %v1049_v7  ;;  %v729_v14 = vadd.f32 %v1839_v51, %v728_v11  ;;  %v977_v17 = vadd.f32 %v1839_v51, %v976_v12 }
 0x136   :  { %v1389_v18 = vpop.f32.mrf.mxu0  ;;  %v1437_v21 = vpop.f32.mrf.mxu1 }
 0x137   :  { %v1091_v22 = vmax.f32 %v1855_v25, %v1070_v13  ;;  %v802_v23 = vmax.f32 %v729_v14, 0.0  ;;  %v1050_v16 = vmax.f32 %v977_v17, 0.0 }
 0x138   :  { %v731_v24 = vpop.f32.mrf.mxu0  ;;  %v979_v26 = vpop.f32.mrf.mxu1 }
 0x139   :  { %1113 = vst.msk [vmem:[%s2077_s6 + $0x18] sm:$0xff] %vm1109_vm4, %v1091_v22  ;;  %v1071_v27 = vmax.f32 %v802_v23, %v1050_v16  ;;  %v732_v28 = vadd.f32 %v1839_v51, %v731_v24  ;;  %v980_v30 = vadd.f32 %v1839_v51, %v979_v26 }
 0x13a   :  { %v1390_v32 = vpop.f32.mrf.mxu0  ;;  %v1438_v33 = vpop.f32.mrf.mxu1 }
 0x13b   :  { %v1092_v35 = vmax.f32 %v1859_v34, %v1071_v27  ;;  %v803_v36 = vmax.f32 %v732_v28, 0.0  ;;  %v1051_v25 = vmax.f32 %v980_v30, 0.0 }
 0x13c   :  { %v736_v37 = vpop.f32.mrf.mxu0  ;;  %v984_v38 = vpop.f32.mrf.mxu1 }
 0x13d   :  { %1114 = vst.msk [vmem:[%s2077_s6 + $0x20] sm:$0xff] %vm1109_vm4, %v1092_v35  ;;  %v1072_v40 = vmax.f32 %v803_v36, %v1051_v25  ;;  %v737_v41 = vadd.f32 %v1839_v51, %v736_v37  ;;  %v985_v44 = vadd.f32 %v1839_v51, %v984_v38 }
 0x13e   :  { %v1393_v45 = vpop.f32.mrf.mxu0  ;;  %v1441_v46 = vpop.f32.mrf.mxu1 }
 0x13f   :  { %v1093_v47 = vmax.f32 %v1863_v43, %v1072_v40  ;;  %v804_v48 = vmax.f32 %v737_v41, 0.0  ;;  %v1052_v34 = vmax.f32 %v985_v44, 0.0 }
 0x140   :  { %v739_v50 = vpop.f32.mrf.mxu0  ;;  %v987_v52 = vpop.f32.mrf.mxu1 }
 0x141   :  { %1115 = vst.msk [vmem:[%s2077_s6 + $0x28] sm:$0xff] %vm1109_vm4, %v1093_v47  ;;  %v1073_v54 = vmax.f32 %v804_v48, %v1052_v34  ;;  %v740_v56 = vadd.f32 %v1839_v51, %v739_v50  ;;  %v988_v57 = vadd.f32 %v1839_v51, %v987_v52 }
 0x142   :  { %v1394_v58 = vpop.f32.mrf.mxu0  ;;  %v1442_v62 = vpop.f32.mrf.mxu1 }
 0x143   :  { %v1094_v59 = vmax.f32 %v1867_v53, %v1073_v54  ;;  %v805_v61 = vmax.f32 %v740_v56, 0.0  ;;  %v1053_v43 = vmax.f32 %v988_v57, 0.0 }
 0x144   :  { %v744_v0 = vpop.f32.mrf.mxu0  ;;  %v992_v1 = vpop.f32.mrf.mxu1 }
 0x145   :  { %1116 = vst.msk [vmem:[%s2077_s6 + $0x30] sm:$0xff] %vm1109_vm4, %v1094_v59  ;;  %v1074_v2 = vmax.f32 %v805_v61, %v1053_v43  ;;  %v745_v4 = vadd.f32 %v1839_v51, %v744_v0  ;;  %v993_v5 = vadd.f32 %v1839_v51, %v992_v1 }
 0x146   :  { %v1397_v6 = vpop.f32.mrf.mxu0  ;;  %v1445_v10 = vpop.f32.mrf.mxu1 }
 0x147   :  { %v1095_v7 = vmax.f32 %v1871_v63, %v1074_v2  ;;  %v806_v11 = vmax.f32 %v745_v4, 0.0  ;;  %v1054_v53 = vmax.f32 %v993_v5, 0.0 }
 0x148   :  { %v747_v12 = vpop.f32.mrf.mxu0  ;;  %v995_v13 = vpop.f32.mrf.mxu1 }
 0x149   :  { %1117 = vst.msk [vmem:[%s2077_s6 + $0x38] sm:$0xff] %vm1109_vm4, %v1095_v7  ;;  %v1075_v14 = vmax.f32 %v806_v11, %v1054_v53  ;;  %v748_v17 = vadd.f32 %v1839_v51, %v747_v12  ;;  %v996_v18 = vadd.f32 %v1839_v51, %v995_v13 }
 0x14a   :  { %v1398_v21 = vpop.f32.mrf.mxu0  ;;  %v1446_v22 = vpop.f32.mrf.mxu1 }
 0x14b   :  { %v1096_v23 = vmax.f32 %v1875_v9, %v1075_v14  ;;  %v807_v16 = vmax.f32 %v748_v17, 0.0  ;;  %v1055_v63 = vmax.f32 %v996_v18, 0.0 }
 0x14c   :  { %v752_v24 = vpop.f32.mrf.mxu0  ;;  %v1000_v26 = vpop.f32.mrf.mxu1 }
 0x14d   :  { %1118 = vst.msk [vmem:[%s2077_s6 + $0x40] sm:$0xff] %vm1109_vm4, %v1096_v23  ;;  %v1076_v27 = vmax.f32 %v807_v16, %v1055_v63  ;;  %v753_v28 = vadd.f32 %v1839_v51, %v752_v24  ;;  %v1001_v30 = vadd.f32 %v1839_v51, %v1000_v26 }
 0x14e   :  { %v1401_v32 = vpop.f32.mrf.mxu0  ;;  %v1449_v33 = vpop.f32.mrf.mxu1 }
 0x14f   :  { %v1097_v35 = vmax.f32 %v1879_v19, %v1076_v27  ;;  %v808_v36 = vmax.f32 %v753_v28, 0.0  ;;  %v1056_v9 = vmax.f32 %v1001_v30, 0.0 }
 0x150   :  { %v755_v25 = vpop.f32.mrf.mxu0  ;;  %v1003_v37 = vpop.f32.mrf.mxu1 }
 0x151   :  { %1119 = vst.msk [vmem:[%s2077_s6 + $0x48] sm:$0xff] %vm1109_vm4, %v1097_v35  ;;  %v1077_v38 = vmax.f32 %v808_v36, %v1056_v9  ;;  %v756_v40 = vadd.f32 %v1839_v51, %v755_v25  ;;  %v1004_v41 = vadd.f32 %v1839_v51, %v1003_v37 }
 0x152   :  { %v1402_v44 = vpop.f32.mrf.mxu0  ;;  %v1450_v45 = vpop.f32.mrf.mxu1 }
 0x153   :  { %v1098_v46 = vmax.f32 %v1883_v29, %v1077_v38  ;;  %v809_v47 = vmax.f32 %v756_v40, 0.0  ;;  %v1057_v19 = vmax.f32 %v1004_v41, 0.0 }
 0x154   :  { %v760_v48 = vpop.f32.mrf.mxu0  ;;  %v1008_v34 = vpop.f32.mrf.mxu1 }
 0x155   :  { %1120 = vst.msk [vmem:[%s2077_s6 + $0x50] sm:$0xff] %vm1109_vm4, %v1098_v46  ;;  %v1078_v50 = vmax.f32 %v809_v47, %v1057_v19  ;;  %v761_v52 = vadd.f32 %v1839_v51, %v760_v48  ;;  %v1009_v54 = vadd.f32 %v1839_v51, %v1008_v34 }
 0x156   :  { %v1405_v56 = vpop.f32.mrf.mxu0  ;;  %v1453_v57 = vpop.f32.mrf.mxu1 }
 0x157   :  { %v1099_v58 = vmax.f32 %v1887_v39, %v1078_v50  ;;  %v810_v62 = vmax.f32 %v761_v52, 0.0  ;;  %v1058_v29 = vmax.f32 %v1009_v54, 0.0 }
 0x158   :  { %v763_v59 = vpop.f32.mrf.mxu0  ;;  %v1011_v61 = vpop.f32.mrf.mxu1 }
 0x159   :  { %1121 = vst.msk [vmem:[%s2077_s6 + $0x58] sm:$0xff] %vm1109_vm4, %v1099_v58  ;;  %v1079_v43 = vmax.f32 %v810_v62, %v1058_v29  ;;  %v764_v0 = vadd.f32 %v1839_v51, %v763_v59  ;;  %v1012_v1 = vadd.f32 %v1839_v51, %v1011_v61 }
 0x15a   :  { %v1406_v2 = vpop.f32.mrf.mxu0  ;;  %v1454_v4 = vpop.f32.mrf.mxu1 }
 0x15b   :  { %v1100_v5 = vmax.f32 %v1891_v49, %v1079_v43  ;;  %v811_v6 = vmax.f32 %v764_v0, 0.0  ;;  %v1059_v39 = vmax.f32 %v1012_v1, 0.0 }
 0x15c   :  { %v768_v10 = vpop.f32.mrf.mxu0  ;;  %v1016_v7 = vpop.f32.mrf.mxu1 }
 0x15d   :  { %1122 = vst.msk [vmem:[%s2077_s6 + $0x60] sm:$0xff] %vm1109_vm4, %v1100_v5  ;;  %v1080_v11 = vmax.f32 %v811_v6, %v1059_v39  ;;  %v769_v53 = vadd.f32 %v1839_v51, %v768_v10  ;;  %v1017_v12 = vadd.f32 %v1839_v51, %v1016_v7 }
 0x15e   :  { %v1409_v13 = vpop.f32.mrf.mxu0  ;;  %v1457_v14 = vpop.f32.mrf.mxu1 }
 0x15f   :  { %v1101_v17 = vmax.f32 %v1895_v60, %v1080_v11  ;;  %v812_v18 = vmax.f32 %v769_v53, 0.0  ;;  %v1060_v49 = vmax.f32 %v1017_v12, 0.0 }
 0x160   :  { %v771_v21 = vpop.f32.mrf.mxu0  ;;  %v1019_v22 = vpop.f32.mrf.mxu1 }
 0x161   :  { %1123 = vst.msk [vmem:[%s2077_s6 + $0x68] sm:$0xff] %vm1109_vm4, %v1101_v17  ;;  %v1081_v23 = vmax.f32 %v812_v18, %v1060_v49  ;;  %v772_v16 = vadd.f32 %v1839_v51, %v771_v21  ;;  %v1020_v63 = vadd.f32 %v1839_v51, %v1019_v22 }
 0x162   :  { %v1410_v24 = vpop.f32.mrf.mxu0  ;;  %v1458_v26 = vpop.f32.mrf.mxu1 }
 0x163   :  { %v1102_v27 = vmax.f32 %v1899_v8, %v1081_v23  ;;  %v813_v28 = vmax.f32 %v772_v16, 0.0  ;;  %v1061_v60 = vmax.f32 %v1020_v63, 0.0 }
 0x164   :  { %v776_v30 = vpop.f32.mrf.mxu0  ;;  %v1024_v32 = vpop.f32.mrf.mxu1 }
 0x165   :  { %1124 = vst.msk [vmem:[%s2077_s6 + $0x70] sm:$0xff] %vm1109_vm4, %v1102_v27  ;;  %v1082_v33 = vmax.f32 %v813_v28, %v1061_v60  ;;  %v777_v35 = vadd.f32 %v1839_v51, %v776_v30  ;;  %v1025_v36 = vadd.f32 %v1839_v51, %v1024_v32 }
 0x166   :  { %v1413_v9 = vpop.f32.mrf.mxu0  ;;  %v1461_v25 = vpop.f32.mrf.mxu1 }
 0x167   :  { %v1103_v37 = vmax.f32 %v1903_v20, %v1082_v33  ;;  %v814_v38 = vmax.f32 %v777_v35, 0.0  ;;  %v1062_v8 = vmax.f32 %v1025_v36, 0.0 }
 0x168   :  { %v779_v40 = vpop.f32.mrf.mxu0  ;;  %v1027_v41 = vpop.f32.mrf.mxu1 }
 0x169   :  { %1125 = vst.msk [vmem:[%s2077_s6 + $0x78] sm:$0xff] %vm1109_vm4, %v1103_v37  ;;  %v1083_v44 = vmax.f32 %v814_v38, %v1062_v8  ;;  %v780_v45 = vadd.f32 %v1839_v51, %v779_v40  ;;  %v1028_v46 = vadd.f32 %v1839_v51, %v1027_v41 }
 0x16a   :  { %v1414_v47 = vpop.f32.mrf.mxu0  ;;  %v1462_v19 = vpop.f32.mrf.mxu1 }
 0x16b   :  { %v1104_v48 = vmax.f32 %v1907_v31, %v1083_v44  ;;  %v815_v34 = vmax.f32 %v780_v45, 0.0  ;;  %v1063_v20 = vmax.f32 %v1028_v46, 0.0 }
 0x16c   :  { %v784_v50 = vpop.f32.mrf.mxu0  ;;  %v1032_v52 = vpop.f32.mrf.mxu1 }
 0x16d   :  { %1126 = vst.msk [vmem:[%s2077_s6 + $0x80] sm:$0xff] %vm1109_vm4, %v1104_v48  ;;  %v1084_v54 = vmax.f32 %v815_v34, %v1063_v20  ;;  %v785_v56 = vadd.f32 %v1839_v51, %v784_v50  ;;  %v1033_v57 = vadd.f32 %v1839_v51, %v1032_v52 }
 0x16e   :  { %v1417_v58 = vpop.f32.mrf.mxu0  ;;  %v1465_v62 = vpop.f32.mrf.mxu1 }
 0x16f   :  { %v1105_v29 = vmax.f32 %v1911_v42, %v1084_v54  ;;  %v816_v59 = vmax.f32 %v785_v56, 0.0  ;;  %v1064_v31 = vmax.f32 %v1033_v57, 0.0 }
 0x170   :  { %v787_v61 = vpop.f32.mrf.mxu0  ;;  %v1035_v43 = vpop.f32.mrf.mxu1 }
 0x171   :  { %1127 = vst.msk [vmem:[%s2077_s6 + $0x88] sm:$0xff] %vm1109_vm4, %v1105_v29  ;;  %v1085_v0 = vmax.f32 %v816_v59, %v1064_v31  ;;  %v788_v1 = vadd.f32 %v1839_v51, %v787_v61  ;;  %v1036_v2 = vadd.f32 %v1839_v51, %v1035_v43 }
 0x172   :  { %v1418_v4 = vpop.f32.mrf.mxu0  ;;  %v1466_v5 = vpop.f32.mrf.mxu1 }
 0x173   :  { %v1106_v6 = vmax.f32 %v1915_v55, %v1085_v0  ;;  %v817_v39 = vmax.f32 %v788_v1, 0.0  ;;  %v1065_v42 = vmax.f32 %v1036_v2, 0.0 }
 0x174   :  { %v792_v10 = vpop.f32.mrf.mxu0  ;;  %v1040_v7 = vpop.f32.mrf.mxu1 }
 0x175   :  { %1128 = vst.msk [vmem:[%s2077_s6 + $0x90] sm:$0xff] %vm1109_vm4, %v1106_v6  ;;  %v1086_v11 = vmax.f32 %v817_v39, %v1065_v42  ;;  %v793_v53 = vadd.f32 %v1839_v51, %v792_v10  ;;  %v1041_v12 = vadd.f32 %v1839_v51, %v1040_v7 }
 0x176   :  { %v1421_v13 = vpop.f32.mrf.mxu0  ;;  %v1469_v14 = vpop.f32.mrf.mxu1 }
 0x177   :  { %v1107_v17 = vmax.f32 %v1919_v3, %v1086_v11  ;;  %v818_v18 = vmax.f32 %v793_v53, 0.0  ;;  %v1066_v55 = vmax.f32 %v1041_v12, 0.0 }
 0x178   :  { %v795_v49 = vpop.f32.mrf.mxu0  ;;  %v1043_v21 = vpop.f32.mrf.mxu1 }
 0x179   :  { %1129 = vst.msk [vmem:[%s2077_s6 + $0x98] sm:$0xff] %vm1109_vm4, %v1107_v17  ;;  %v1087_v22 = vmax.f32 %v818_v18, %v1066_v55 }
 0x17a   :  { %v1422_v23 = vpop.f32.mrf.mxu0  ;;  %v1470_v16 = vpop.f32.mrf.mxu1 }
 0x17b   :  { %v1108_v63 = vmax.f32 %v1923_v15, %v1087_v22 }
 0x17d   :  { %1131 = vst.msk [vmem:[%s2077_s6 + $0xa0] sm:$0x3] %vm1130_vm5, %v1108_v63 }

// kernel: forward.7
= control target key start
LH: loop header
LB: loop body
LE: loop exit
PB: predicated region body
PF: predicated region fallthrough
CT: control target
= control target key end

     0   :  { %v557_v0 = vmov 0   ;;  %vm153_vm0 = vcmask 588800   ;;  %vm160_vm1 = vcmask 1043456   ;;  %vm472_vm2 = vcmask 130048   ;;  %s837_s4 = inlined_call_operand.vmem [shape: bf16[200,16], index: 4, kind: input, shape index: {}]   ;;  %s838_s0 = inlined_call_operand.vmem [shape: bf16[32,200], index: 0, kind: input, shape index: {}]   ;;  %s839_s1 = inlined_call_operand.vmem [shape: bf16[32,200], index: 1, kind: input, shape index: {}]   ;;  %s840_s2 = inlined_call_operand.vmem [shape: bf16[32,200], index: 2, kind: input, shape index: {}]   ;;  %s841_s3 = inlined_call_operand.vmem [shape: bf16[32,200], index: 3, kind: input, shape index: {}]   ;;  %s842_s5 = inlined_call_operand.vmem [shape: f32[1,16], index: 5, kind: input, shape index: {}]   ;;  %s843_s6 = inlined_call_operand.vmem [shape: f32[32,16], index: 6, kind: output, shape index: {}]  }
   0x1   :  { %164 = vmatprep.subr.bf16.mxu0 %v557_v0  ;;  %245 = vmatprep.subr.bf16.mxu1 %v557_v0  ;;  %v598_v1 = vld [vmem:[%s837_s4 + $0x38] sm:$0xff]   ;;  %v605_v2 = vld [vmem:[%s837_s4 + $0x30] sm:$0xff]   ;;  %v614_v3 = vld [vmem:[%s837_s4 + $0x28] sm:$0xff]  }
   0x2   :  { %165 = vmatpush1.bf16.msra.mxu0 %v598_v1  ;;  %246 = vmatpush1.bf16.msra.mxu1 %v598_v1  ;;  %v623_v4 = vld [vmem:[%s837_s4 + $0x20] sm:$0xff]   ;;  %v635_v6 = vld [vmem:[%s837_s4 + $0x18] sm:$0xff]   ;;  %v649_v8 = vld [vmem:[%s837_s4 + $0x10] sm:$0xff]  }
   0x3   :  { %166 = vmatprep.subr.bf16.mxu0 %v557_v0  ;;  %247 = vmatprep.subr.bf16.mxu1 %v557_v0  ;;  %v535_v5 = vld [vmem:[%s838_s0 + $0x4] ss:$8 sps:$4 sm:$0xff]   ;;  %v528_v11 = vld [vmem:[%s837_s4 + $0x60] ss:$0 sps:$4 sm:$0xff]   ;;  %v685_v13 = vld [vmem:[%s837_s4 + $0x58] sm:$0xff]  }
   0x4   :  { %v538_v7 = vld [vmem:[%s839_s1 + $0x4] ss:$8 sps:$4 sm:$0xff]   ;;  %499 = vmatprep.mubr.msk.bf16.mxu0 %vm153_vm0, %v535_v5  ;;  %v678_v12 = vsel %vm160_vm1, %v528_v11, 0  ;;  %v694_v14 = vld [vmem:[%s837_s4 + $0x50] sm:$0xff]   ;;  %v533_v17 = vld [vmem:[%s838_s0] ss:$8 sps:$4 sm:$0xff]  }
   0x5   :  { %505 = vmatprep.mubr.msk.bf16.mxu1 %vm153_vm0, %v538_v7  ;;  %v658_v9 = vld [vmem:[%s837_s4 + $0x8] sm:$0xff]   ;;  %v667_v10 = vld [vmem:[%s837_s4] sm:$0xff]   ;;  %v539_v19 = vld [vmem:[%s838_s0 + $0x14] ss:$8 sps:$4 sm:$0xff]  }
   0x6   :  { %167 = vmatpush1.bf16.msra.mxu0 %v605_v2  ;;  %248 = vmatpush1.bf16.msra.mxu1 %v605_v2  ;;  %v703_v15 = vld [vmem:[%s837_s4 + $0x48] sm:$0xff]   ;;  %v712_v16 = vld [vmem:[%s837_s4 + $0x40] sm:$0xff]   ;;  %v541_v20 = vld [vmem:[%s839_s1 + $0x14] ss:$8 sps:$4 sm:$0xff]  }
   0x7   :  { %168 = vmatprep.subr.bf16.mxu0 %v557_v0  ;;  %249 = vmatprep.subr.bf16.mxu1 %v557_v0  ;;  %v536_v18 = vld [vmem:[%s839_s1] ss:$8 sps:$4 sm:$0xff]   ;;  %v543_v21 = vld [vmem:[%s838_s0 + $0x10] ss:$8 sps:$4 sm:$0xff]   ;;  %v547_v23 = vld [vmem:[%s840_s2 + $0x4] ss:$8 sps:$4 sm:$0xff]  }
   0x8   :  { %v544_v22 = vld [vmem:[%s839_s1 + $0x10] ss:$8 sps:$4 sm:$0xff]   ;;  %v550_v24 = vld [vmem:[%s841_s3 + $0x4] ss:$8 sps:$4 sm:$0xff]   ;;  %v545_v25 = vld [vmem:[%s840_s2] ss:$8 sps:$4 sm:$0xff]  }
   0x9   :  { %v548_v26 = vld [vmem:[%s841_s3] ss:$8 sps:$4 sm:$0xff]   ;;  %v551_v27 = vld [vmem:[%s840_s2 + $0x14] ss:$8 sps:$4 sm:$0xff]   ;;  %v555_v29 = vld [vmem:[%s840_s2 + $0x10] ss:$8 sps:$4 sm:$0xff]  }
   0xa   :  { %169 = vmatpush1.bf16.msra.mxu0 %v614_v3  ;;  %250 = vmatpush1.bf16.msra.mxu1 %v614_v3  ;;  %v553_v28 = vld [vmem:[%s841_s3 + $0x14] ss:$8 sps:$4 sm:$0xff]   ;;  %v556_v30 = vld [vmem:[%s841_s3 + $0x10] ss:$8 sps:$4 sm:$0xff]   ;;  %v481_v47 = vld [vmem:[%s842_s5] ss:$0 sm:$0xff] }
   0xb   :  { %170 = vmatprep.subr.bf16.mxu0 %v557_v0  ;;  %251 = vmatprep.subr.bf16.mxu1 %v557_v0 }
   0xe   :  { %171 = vmatpush1.bf16.msra.mxu0 %v623_v4  ;;  %252 = vmatpush1.bf16.msra.mxu1 %v623_v4 }
   0xf   :  { %172 = vmatprep.subr.bf16.mxu0 %v557_v0  ;;  %253 = vmatprep.subr.bf16.mxu1 %v557_v0 }
  0x12   :  { %173 = vmatpush1.bf16.msra.mxu0 %v635_v6  ;;  %254 = vmatpush1.bf16.msra.mxu1 %v635_v6 }
  0x13   :  { %174 = vmatprep.subr.bf16.mxu0 %v557_v0  ;;  %255 = vmatprep.subr.bf16.mxu1 %v557_v0 }
  0x16   :  { %175 = vmatpush1.bf16.msra.mxu0 %v649_v8  ;;  %256 = vmatpush1.bf16.msra.mxu1 %v649_v8 }
  0x17   :  { %176 = vmatprep.subr.bf16.mxu0 %v557_v0  ;;  %257 = vmatprep.subr.bf16.mxu1 %v557_v0 }
  0x1a   :  { %177 = vmatpush1.bf16.msra.mxu0 %v658_v9  ;;  %258 = vmatpush1.bf16.msra.mxu1 %v658_v9 }
  0x1b   :  { %178 = vmatprep.subr.bf16.mxu0 %v557_v0  ;;  %259 = vmatprep.subr.bf16.mxu1 %v557_v0 }
  0x1e   :  { %179 = vmatpush1.bf16.msra.mxu0 %v667_v10  ;;  %260 = vmatpush1.bf16.msra.mxu1 %v667_v10 }
  0x1f   :  { %186 = vmatprep.subr.bf16.mxu0 %v557_v0  ;;  %267 = vmatprep.subr.bf16.mxu1 %v557_v0 }
  0x22   :  { %187 = vmatpush2.bf16.msra.mxu0 %v678_v12  ;;  %268 = vmatpush2.bf16.msra.mxu1 %v678_v12 }
  0x23   :  { %188 = vmatprep.subr.bf16.mxu0 %v557_v0  ;;  %269 = vmatprep.subr.bf16.mxu1 %v557_v0 }
  0x26   :  { %189 = vmatpush2.bf16.msra.mxu0 %v685_v13  ;;  %270 = vmatpush2.bf16.msra.mxu1 %v685_v13 }
  0x27   :  { %190 = vmatprep.subr.bf16.mxu0 %v557_v0  ;;  %271 = vmatprep.subr.bf16.mxu1 %v557_v0 }
  0x2a   :  { %191 = vmatpush2.bf16.msra.mxu0 %v694_v14  ;;  %272 = vmatpush2.bf16.msra.mxu1 %v694_v14 }
  0x2b   :  { %192 = vmatprep.subr.bf16.mxu0 %v557_v0  ;;  %273 = vmatprep.subr.bf16.mxu1 %v557_v0 }
  0x2e   :  { %193 = vmatpush2.bf16.msra.mxu0 %v703_v15  ;;  %274 = vmatpush2.bf16.msra.mxu1 %v703_v15 }
  0x2f   :  { %194 = vmatprep.subr.bf16.mxu0 %v557_v0  ;;  %275 = vmatprep.subr.bf16.mxu1 %v557_v0 }
  0x32   :  { %195 = vmatpush2.bf16.msra.mxu0 %v712_v16  ;;  %276 = vmatpush2.bf16.msra.mxu1 %v712_v16 }
  0x33   :  { %330 = vmatprep.subr.bf16.mxu0 %v557_v0  ;;  %411 = vmatprep.subr.bf16.mxu1 %v557_v0 }
  0x35   :  { %197 = vmatmul.mubr.bf16.vlgmr.msra.gmra.mxu0 %v533_v17  ;;  %278 = vmatmul.mubr.bf16.vlgmr.msra.gmra.mxu1 %v536_v18 }
  0x36   :  { %331 = vmatpush1.bf16.msra.mxu0 %v598_v1  ;;  %412 = vmatpush1.bf16.msra.mxu1 %v598_v1 }
  0x37   :  { %332 = vmatprep.subr.bf16.mxu0 %v557_v0  ;;  %413 = vmatprep.subr.bf16.mxu1 %v557_v0 }
  0x38   :  { %500 = vmatprep.mubr.msk.bf16.mxu0 %vm153_vm0, %v539_v19  ;;  %506 = vmatprep.mubr.msk.bf16.mxu1 %vm153_vm0, %v541_v20 }
  0x3a   :  { %333 = vmatpush1.bf16.msra.mxu0 %v605_v2  ;;  %414 = vmatpush1.bf16.msra.mxu1 %v605_v2 }
  0x3b   :  { %334 = vmatprep.subr.bf16.mxu0 %v557_v0  ;;  %415 = vmatprep.subr.bf16.mxu1 %v557_v0 }
  0x3d   :  { %205 = vmatmul.mubr.bf16.gmra.mxu0 %v543_v21  ;;  %286 = vmatmul.mubr.bf16.gmra.mxu1 %v544_v22 }
  0x3e   :  { %335 = vmatpush1.bf16.msra.mxu0 %v614_v3  ;;  %416 = vmatpush1.bf16.msra.mxu1 %v614_v3 }
  0x3f   :  { %336 = vmatprep.subr.bf16.mxu0 %v557_v0  ;;  %417 = vmatprep.subr.bf16.mxu1 %v557_v0 }
  0x40   :  { %511 = vmatprep.mubr.msk.bf16.mxu0 %vm153_vm0, %v547_v23  ;;  %517 = vmatprep.mubr.msk.bf16.mxu1 %vm153_vm0, %v550_v24 }
  0x42   :  { %337 = vmatpush1.bf16.msra.mxu0 %v623_v4  ;;  %418 = vmatpush1.bf16.msra.mxu1 %v623_v4 }
  0x43   :  { %338 = vmatprep.subr.bf16.mxu0 %v557_v0  ;;  %419 = vmatprep.subr.bf16.mxu1 %v557_v0 }
  0x46   :  { %339 = vmatpush1.bf16.msra.mxu0 %v635_v6  ;;  %420 = vmatpush1.bf16.msra.mxu1 %v635_v6 }
  0x47   :  { %340 = vmatprep.subr.bf16.mxu0 %v557_v0  ;;  %421 = vmatprep.subr.bf16.mxu1 %v557_v0 }
  0x4a   :  { %341 = vmatpush1.bf16.msra.mxu0 %v649_v8  ;;  %422 = vmatpush1.bf16.msra.mxu1 %v649_v8 }
  0x4b   :  { %342 = vmatprep.subr.bf16.mxu0 %v557_v0  ;;  %423 = vmatprep.subr.bf16.mxu1 %v557_v0 }
  0x4e   :  { %343 = vmatpush1.bf16.msra.mxu0 %v658_v9  ;;  %424 = vmatpush1.bf16.msra.mxu1 %v658_v9 }
  0x4f   :  { %344 = vmatprep.subr.bf16.mxu0 %v557_v0  ;;  %425 = vmatprep.subr.bf16.mxu1 %v557_v0 }
  0x52   :  { %345 = vmatpush1.bf16.msra.mxu0 %v667_v10  ;;  %426 = vmatpush1.bf16.msra.mxu1 %v667_v10 }
  0x53   :  { %352 = vmatprep.subr.bf16.mxu0 %v557_v0  ;;  %433 = vmatprep.subr.bf16.mxu1 %v557_v0 }
  0x56   :  { %353 = vmatpush2.bf16.msra.mxu0 %v678_v12  ;;  %434 = vmatpush2.bf16.msra.mxu1 %v678_v12 }
  0x57   :  { %354 = vmatprep.subr.bf16.mxu0 %v557_v0  ;;  %435 = vmatprep.subr.bf16.mxu1 %v557_v0 }
  0x5a   :  { %355 = vmatpush2.bf16.msra.mxu0 %v685_v13  ;;  %436 = vmatpush2.bf16.msra.mxu1 %v685_v13 }
  0x5b   :  { %356 = vmatprep.subr.bf16.mxu0 %v557_v0  ;;  %437 = vmatprep.subr.bf16.mxu1 %v557_v0 }
  0x5e   :  { %357 = vmatpush2.bf16.msra.mxu0 %v694_v14  ;;  %438 = vmatpush2.bf16.msra.mxu1 %v694_v14 }
  0x5f   :  { %358 = vmatprep.subr.bf16.mxu0 %v557_v0  ;;  %439 = vmatprep.subr.bf16.mxu1 %v557_v0 }
  0x62   :  { %359 = vmatpush2.bf16.msra.mxu0 %v703_v15  ;;  %440 = vmatpush2.bf16.msra.mxu1 %v703_v15 }
  0x63   :  { %360 = vmatprep.subr.bf16.mxu0 %v557_v0  ;;  %441 = vmatprep.subr.bf16.mxu1 %v557_v0 }
  0x66   :  { %361 = vmatpush2.bf16.msra.mxu0 %v712_v16  ;;  %442 = vmatpush2.bf16.msra.mxu1 %v712_v16 }
  0x69   :  { %363 = vmatmul.mubr.bf16.vlgmr.msra.gmra.mxu0 %v545_v25  ;;  %444 = vmatmul.mubr.bf16.vlgmr.msra.gmra.mxu1 %v548_v26 }
  0x6a   :  { %512 = vmatprep.mubr.msk.bf16.mxu0 %vm153_vm0, %v551_v27  ;;  %518 = vmatprep.mubr.msk.bf16.mxu1 %vm153_vm0, %v553_v28 }
  0x71   :  { %371 = vmatmul.mubr.bf16.gmra.mxu0 %v555_v29  ;;  %452 = vmatmul.mubr.bf16.gmra.mxu1 %v556_v30 }
  0xf5   :  { %v198_v31 = vpop.f32.mrf.mxu0  ;;  %v279_v32 = vpop.f32.mrf.mxu1 }
  0xf6   :  { %v199_v48 = vadd.f32 %v481_v47, %v198_v31  ;;  %v280_v49 = vadd.f32 %v481_v47, %v279_v32 }
  0xf7   :  { %v200_v33 = vpop.f32.mrf.mxu0  ;;  %v281_v34 = vpop.f32.mrf.mxu1 }
  0xf8   :  { %v213_v54 = vmax.f32 %v199_v48, 0.0  ;;  %v294_v55 = vmax.f32 %v280_v49, 0.0 }
  0xf9   :  { %v201_v35 = vpop.f32.mrf.mxu0  ;;  %v282_v36 = vpop.f32.mrf.mxu1 }
  0xfa   :  { %v202_v50 = vadd.f32 %v481_v47, %v201_v35  ;;  %v283_v51 = vadd.f32 %v481_v47, %v282_v36  ;;  %v298_v4 = vmax.f32 %v213_v54, %v294_v55 }
  0xfb   :  { %v203_v37 = vpop.f32.mrf.mxu0  ;;  %v284_v38 = vpop.f32.mrf.mxu1 }
  0xfc   :  { %v214_v62 = vmax.f32 %v202_v50, 0.0  ;;  %v295_v63 = vmax.f32 %v283_v51, 0.0 }
  0xfd   :  { %v206_v39 = vpop.f32.mrf.mxu0  ;;  %v287_v40 = vpop.f32.mrf.mxu1 }
  0xfe   :  { %v207_v0 = vadd.f32 %v481_v47, %v206_v39  ;;  %v288_v1 = vadd.f32 %v481_v47, %v287_v40  ;;  %v299_v13 = vmax.f32 %v214_v62, %v295_v63 }
  0xff   :  { %v208_v41 = vpop.f32.mrf.mxu0  ;;  %v289_v42 = vpop.f32.mrf.mxu1 }
 0x100   :  { %v215_v14 = vmax.f32 %v207_v0, 0.0  ;;  %v296_v15 = vmax.f32 %v288_v1, 0.0 }
 0x101   :  { %v209_v43 = vpop.f32.mrf.mxu0  ;;  %v290_v44 = vpop.f32.mrf.mxu1 }
 0x102   :  { %v210_v16 = vadd.f32 %v481_v47, %v209_v43  ;;  %v291_v19 = vadd.f32 %v481_v47, %v290_v44  ;;  %v300_v28 = vmax.f32 %v215_v14, %v296_v15 }
 0x103   :  { %v211_v45 = vpop.f32.mrf.mxu0  ;;  %v292_v46 = vpop.f32.mrf.mxu1 }
 0x104   :  { %v216_v29 = vmax.f32 %v210_v16, 0.0  ;;  %v297_v32 = vmax.f32 %v291_v19, 0.0 }
 0x106   :  { %v301_v41 = vmax.f32 %v216_v29, %v297_v32 }
 0x129   :  { %v364_v52 = vpop.f32.mrf.mxu0  ;;  %v445_v53 = vpop.f32.mrf.mxu1 }
 0x12a   :  { %v365_v56 = vadd.f32 %v481_v47, %v364_v52  ;;  %v446_v57 = vadd.f32 %v481_v47, %v445_v53 }
 0x12b   :  { %v366_v58 = vpop.f32.mrf.mxu0  ;;  %v447_v59 = vpop.f32.mrf.mxu1 }
 0x12c   :  { %v379_v60 = vmax.f32 %v365_v56, 0.0  ;;  %v460_v61 = vmax.f32 %v446_v57, 0.0 }
 0x12d   :  { %v367_v2 = vpop.f32.mrf.mxu0  ;;  %v448_v3 = vpop.f32.mrf.mxu1 }
 0x12e   :  { %v464_v5 = vmax.f32 %v379_v60, %v460_v61  ;;  %v368_v6 = vadd.f32 %v481_v47, %v367_v2  ;;  %v449_v7 = vadd.f32 %v481_v47, %v448_v3 }
 0x12f   :  { %v369_v8 = vpop.f32.mrf.mxu0  ;;  %v450_v9 = vpop.f32.mrf.mxu1 }
 0x130   :  { %v468_v10 = vmax.f32 %v298_v4, %v464_v5  ;;  %v380_v11 = vmax.f32 %v368_v6, 0.0  ;;  %v461_v12 = vmax.f32 %v449_v7, 0.0 }
 0x131   :  { %v372_v17 = vpop.f32.mrf.mxu0  ;;  %v453_v18 = vpop.f32.mrf.mxu1 }
 0x132   :  { %473 = vst.msk [vmem:[%s843_s6] sm:$0xff] %vm472_vm2, %v468_v10  ;;  %v465_v20 = vmax.f32 %v380_v11, %v461_v12  ;;  %v373_v21 = vadd.f32 %v481_v47, %v372_v17  ;;  %v454_v22 = vadd.f32 %v481_v47, %v453_v18 }
 0x133   :  { %v374_v23 = vpop.f32.mrf.mxu0  ;;  %v455_v24 = vpop.f32.mrf.mxu1 }
 0x134   :  { %v469_v25 = vmax.f32 %v299_v13, %v465_v20  ;;  %v381_v26 = vmax.f32 %v373_v21, 0.0  ;;  %v462_v27 = vmax.f32 %v454_v22, 0.0 }
 0x135   :  { %v375_v30 = vpop.f32.mrf.mxu0  ;;  %v456_v31 = vpop.f32.mrf.mxu1 }
 0x136   :  { %474 = vst.msk [vmem:[%s843_s6 + $0x8] sm:$0xff] %vm472_vm2, %v469_v25  ;;  %v466_v33 = vmax.f32 %v381_v26, %v462_v27  ;;  %v376_v34 = vadd.f32 %v481_v47, %v375_v30  ;;  %v457_v35 = vadd.f32 %v481_v47, %v456_v31 }
 0x137   :  { %v377_v36 = vpop.f32.mrf.mxu0  ;;  %v458_v37 = vpop.f32.mrf.mxu1 }
 0x138   :  { %v470_v38 = vmax.f32 %v300_v28, %v466_v33  ;;  %v382_v39 = vmax.f32 %v376_v34, 0.0  ;;  %v463_v40 = vmax.f32 %v457_v35, 0.0 }
 0x13a   :  { %475 = vst.msk [vmem:[%s843_s6 + $0x10] sm:$0xff] %vm472_vm2, %v470_v38  ;;  %v467_v42 = vmax.f32 %v382_v39, %v463_v40 }
 0x13c   :  { %v471_v43 = vmax.f32 %v301_v41, %v467_v42 }
 0x13e   :  { %476 = vst.msk [vmem:[%s843_s6 + $0x18] sm:$0xff] %vm472_vm2, %v471_v43 }

// kernel: forward.8
= control target key start
LH: loop header
LB: loop body
LE: loop exit
PB: predicated region body
PF: predicated region fallthrough
CT: control target
= control target key end

     0   :  { %v485_v0 = vmov 0   ;;  %vm121_vm0 = vcmask 130048   ;;  %vm415_vm1 = vcmask 123904   ;;  %s660_s4 = inlined_call_operand.vmem [shape: bf16[144,16], index: 4, kind: input, shape index: {}]   ;;  %s661_s0 = inlined_call_operand.vmem [shape: bf16[18,144], index: 0, kind: input, shape index: {}]   ;;  %s662_s1 = inlined_call_operand.vmem [shape: bf16[18,144], index: 1, kind: input, shape index: {}]   ;;  %s663_s2 = inlined_call_operand.vmem [shape: bf16[18,144], index: 2, kind: input, shape index: {}]   ;;  %s664_s3 = inlined_call_operand.vmem [shape: bf16[18,144], index: 3, kind: input, shape index: {}]   ;;  %s665_s5 = inlined_call_operand.vmem [shape: f32[1,16], index: 5, kind: input, shape index: {}]   ;;  %s666_s6 = inlined_call_operand.vmem [shape: f32[18,16], index: 6, kind: output, shape index: {}]  }
   0x1   :  { %128 = vmatprep.subr.bf16.mxu0 %v485_v0  ;;  %203 = vmatprep.subr.bf16.mxu1 %v485_v0  ;;  %v456_v1 = vld [vmem:[%s660_s4 + $0x38] sm:$0xff]   ;;  %v529_v2 = vld [vmem:[%s660_s4 + $0x30] sm:$0xff]   ;;  %v538_v3 = vld [vmem:[%s660_s4 + $0x28] sm:$0xff]  }
   0x2   :  { %129 = vmatpush1.bf16.msra.mxu0 %v456_v1  ;;  %204 = vmatpush1.bf16.msra.mxu1 %v456_v1  ;;  %v547_v4 = vld [vmem:[%s660_s4 + $0x20] sm:$0xff]   ;;  %v460_v7 = vld [vmem:[%s660_s4 + $0x18] sm:$0xff]   ;;  %v461_v8 = vld [vmem:[%s660_s4 + $0x10] sm:$0xff]  }
   0x3   :  { %130 = vmatprep.subr.bf16.mxu0 %v485_v0  ;;  %205 = vmatprep.subr.bf16.mxu1 %v485_v0  ;;  %v467_v5 = vld [vmem:[%s661_s0 + $0x4] ss:$8 sps:$4 sm:$0xff]   ;;  %v45_v12 = vld [vmem:[%s661_s0 + $0x10] sm:$0x11]  ;;  %v465_v13 = vld [vmem:[%s661_s0] ss:$8 sps:$4 sm:$0xff]  }
   0x4   :  { %435 = vmatprep.mubr.msk.bf16.mxu0 %vm121_vm0, %v467_v5  ;;  %v470_v6 = vld [vmem:[%s662_s1 + $0x4] ss:$8 sps:$4 sm:$0xff]   ;;  %v181_v14 = vld [vmem:[%s662_s1 + $0x10] sm:$0x11]  ;;  %v468_v15 = vld [vmem:[%s662_s1] ss:$8 sps:$4 sm:$0xff]   ;;  %v425_v16 = vcombine.high %v45_v12, %v45_v12  ;;  %v424_v18 = vcombine.low %v45_v12, %v45_v12 }
   0x5   :  { %441 = vmatprep.mubr.msk.bf16.mxu1 %vm121_vm0, %v470_v6  ;;  %v462_v9 = vld [vmem:[%s660_s4 + $0x8] sm:$0xff]   ;;  %v463_v10 = vld [vmem:[%s660_s4] sm:$0xff]   ;;  %v440_v17 = vcombine.high %v181_v14, %v181_v14  ;;  %v439_v19 = vcombine.low %v181_v14, %v181_v14  ;;  %v259_v22 = vld [vmem:[%s663_s2 + $0x10] sm:$0x11] }
   0x6   :  { %131 = vmatpush1.bf16.msra.mxu0 %v529_v2  ;;  %206 = vmatpush1.bf16.msra.mxu1 %v529_v2  ;;  %v464_v11 = vld [vmem:[%s660_s4 + $0x40] sm:$0xff]   ;;  %v334_v23 = vld [vmem:[%s664_s3 + $0x10] sm:$0x11]  ;;  %v446_v26 = vcombine.high %v259_v22, %v259_v22  ;;  %v445_v28 = vcombine.low %v259_v22, %v259_v22 }
   0x7   :  { %132 = vmatprep.subr.bf16.mxu0 %v485_v0  ;;  %207 = vmatprep.subr.bf16.mxu1 %v485_v0  ;;  %v477_v20 = vld [vmem:[%s663_s2 + $0x4] ss:$8 sps:$4 sm:$0xff]   ;;  %v475_v24 = vld [vmem:[%s663_s2] ss:$8 sps:$4 sm:$0xff]   ;;  %v452_v27 = vcombine.high %v334_v23, %v334_v23  ;;  %v451_v29 = vcombine.low %v334_v23, %v334_v23 }
   0x8   :  { %v480_v21 = vld [vmem:[%s664_s3 + $0x4] ss:$8 sps:$4 sm:$0xff]   ;;  %v478_v25 = vld [vmem:[%s664_s3] ss:$8 sps:$4 sm:$0xff]  }
   0x9   :  { %v421_v46 = vld [vmem:[%s665_s5] ss:$0 sm:$0xff] }
   0xa   :  { %133 = vmatpush1.bf16.msra.mxu0 %v538_v3  ;;  %208 = vmatpush1.bf16.msra.mxu1 %v538_v3 }
   0xb   :  { %134 = vmatprep.subr.bf16.mxu0 %v485_v0  ;;  %209 = vmatprep.subr.bf16.mxu1 %v485_v0 }
   0xe   :  { %135 = vmatpush1.bf16.msra.mxu0 %v547_v4  ;;  %210 = vmatpush1.bf16.msra.mxu1 %v547_v4 }
   0xf   :  { %136 = vmatprep.subr.bf16.mxu0 %v485_v0  ;;  %211 = vmatprep.subr.bf16.mxu1 %v485_v0 }
  0x12   :  { %137 = vmatpush1.bf16.msra.mxu0 %v460_v7  ;;  %212 = vmatpush1.bf16.msra.mxu1 %v460_v7 }
  0x13   :  { %138 = vmatprep.subr.bf16.mxu0 %v485_v0  ;;  %213 = vmatprep.subr.bf16.mxu1 %v485_v0 }
  0x16   :  { %139 = vmatpush1.bf16.msra.mxu0 %v461_v8  ;;  %214 = vmatpush1.bf16.msra.mxu1 %v461_v8 }
  0x17   :  { %140 = vmatprep.subr.bf16.mxu0 %v485_v0  ;;  %215 = vmatprep.subr.bf16.mxu1 %v485_v0 }
  0x1a   :  { %141 = vmatpush1.bf16.msra.mxu0 %v462_v9  ;;  %216 = vmatpush1.bf16.msra.mxu1 %v462_v9 }
  0x1b   :  { %142 = vmatprep.subr.bf16.mxu0 %v485_v0  ;;  %217 = vmatprep.subr.bf16.mxu1 %v485_v0 }
  0x1e   :  { %143 = vmatpush1.bf16.msra.mxu0 %v463_v10  ;;  %218 = vmatpush1.bf16.msra.mxu1 %v463_v10 }
  0x1f   :  { %158 = vmatprep.subr.bf16.mxu0 %v485_v0  ;;  %233 = vmatprep.subr.bf16.mxu1 %v485_v0 }
  0x22   :  { %159 = vmatpush2.bf16.msra.mxu0 %v464_v11  ;;  %234 = vmatpush2.bf16.msra.mxu1 %v464_v11 }
  0x23   :  { %281 = vmatprep.subr.bf16.mxu0 %v485_v0  ;;  %356 = vmatprep.subr.bf16.mxu1 %v485_v0 }
  0x25   :  { %161 = vmatmul.mubr.bf16.vlgmr.msra.gmra.mxu0 %v465_v13  ;;  %236 = vmatmul.mubr.bf16.vlgmr.msra.gmra.mxu1 %v468_v15 }
  0x26   :  { %282 = vmatpush1.bf16.msra.mxu0 %v456_v1  ;;  %357 = vmatpush1.bf16.msra.mxu1 %v456_v1 }
  0x27   :  { %283 = vmatprep.subr.bf16.mxu0 %v485_v0  ;;  %358 = vmatprep.subr.bf16.mxu1 %v485_v0 }
  0x28   :  { %436 = vmatprep.mubr.msk.bf16.mxu0 %vm121_vm0, %v425_v16  ;;  %442 = vmatprep.mubr.msk.bf16.mxu1 %vm121_vm0, %v440_v17 }
  0x2a   :  { %284 = vmatpush1.bf16.msra.mxu0 %v529_v2  ;;  %359 = vmatpush1.bf16.msra.mxu1 %v529_v2 }
  0x2b   :  { %285 = vmatprep.subr.bf16.mxu0 %v485_v0  ;;  %360 = vmatprep.subr.bf16.mxu1 %v485_v0 }
  0x2d   :  { %169 = vmatmul.mubr.bf16.gmra.mxu0 %v424_v18  ;;  %244 = vmatmul.mubr.bf16.gmra.mxu1 %v439_v19 }
  0x2e   :  { %286 = vmatpush1.bf16.msra.mxu0 %v538_v3  ;;  %361 = vmatpush1.bf16.msra.mxu1 %v538_v3 }
  0x2f   :  { %287 = vmatprep.subr.bf16.mxu0 %v485_v0  ;;  %362 = vmatprep.subr.bf16.mxu1 %v485_v0 }
  0x30   :  { %447 = vmatprep.mubr.msk.bf16.mxu0 %vm121_vm0, %v477_v20  ;;  %453 = vmatprep.mubr.msk.bf16.mxu1 %vm121_vm0, %v480_v21 }
  0x32   :  { %288 = vmatpush1.bf16.msra.mxu0 %v547_v4  ;;  %363 = vmatpush1.bf16.msra.mxu1 %v547_v4 }
  0x33   :  { %289 = vmatprep.subr.bf16.mxu0 %v485_v0  ;;  %364 = vmatprep.subr.bf16.mxu1 %v485_v0 }
  0x36   :  { %290 = vmatpush1.bf16.msra.mxu0 %v460_v7  ;;  %365 = vmatpush1.bf16.msra.mxu1 %v460_v7 }
  0x37   :  { %291 = vmatprep.subr.bf16.mxu0 %v485_v0  ;;  %366 = vmatprep.subr.bf16.mxu1 %v485_v0 }
  0x3a   :  { %292 = vmatpush1.bf16.msra.mxu0 %v461_v8  ;;  %367 = vmatpush1.bf16.msra.mxu1 %v461_v8 }
  0x3b   :  { %293 = vmatprep.subr.bf16.mxu0 %v485_v0  ;;  %368 = vmatprep.subr.bf16.mxu1 %v485_v0 }
  0x3e   :  { %294 = vmatpush1.bf16.msra.mxu0 %v462_v9  ;;  %369 = vmatpush1.bf16.msra.mxu1 %v462_v9 }
  0x3f   :  { %295 = vmatprep.subr.bf16.mxu0 %v485_v0  ;;  %370 = vmatprep.subr.bf16.mxu1 %v485_v0 }
  0x42   :  { %296 = vmatpush1.bf16.msra.mxu0 %v463_v10  ;;  %371 = vmatpush1.bf16.msra.mxu1 %v463_v10 }
  0x43   :  { %311 = vmatprep.subr.bf16.mxu0 %v485_v0  ;;  %386 = vmatprep.subr.bf16.mxu1 %v485_v0 }
  0x46   :  { %312 = vmatpush2.bf16.msra.mxu0 %v464_v11  ;;  %387 = vmatpush2.bf16.msra.mxu1 %v464_v11 }
  0x49   :  { %314 = vmatmul.mubr.bf16.vlgmr.msra.gmra.mxu0 %v475_v24  ;;  %389 = vmatmul.mubr.bf16.vlgmr.msra.gmra.mxu1 %v478_v25 }
  0x4a   :  { %448 = vmatprep.mubr.msk.bf16.mxu0 %vm121_vm0, %v446_v26  ;;  %454 = vmatprep.mubr.msk.bf16.mxu1 %vm121_vm0, %v452_v27 }
  0x51   :  { %322 = vmatmul.mubr.bf16.gmra.mxu0 %v445_v28  ;;  %397 = vmatmul.mubr.bf16.gmra.mxu1 %v451_v29 }
  0xe5   :  { %v162_v30 = vpop.f32.mrf.mxu0  ;;  %v237_v31 = vpop.f32.mrf.mxu1 }
  0xe6   :  { %v163_v47 = vadd.f32 %v421_v46, %v162_v30  ;;  %v238_v48 = vadd.f32 %v421_v46, %v237_v31 }
  0xe7   :  { %v164_v32 = vpop.f32.mrf.mxu0  ;;  %v239_v33 = vpop.f32.mrf.mxu1 }
  0xe8   :  { %v176_v49 = vmax.f32 %v163_v47, 0.0  ;;  %v251_v50 = vmax.f32 %v238_v48, 0.0 }
  0xe9   :  { %v165_v34 = vpop.f32.mrf.mxu0  ;;  %v240_v35 = vpop.f32.mrf.mxu1 }
  0xea   :  { %v166_v51 = vadd.f32 %v421_v46, %v165_v34  ;;  %v241_v52 = vadd.f32 %v421_v46, %v240_v35  ;;  %v254_v61 = vmax.f32 %v176_v49, %v251_v50 }
  0xeb   :  { %v167_v36 = vpop.f32.mrf.mxu0  ;;  %v242_v37 = vpop.f32.mrf.mxu1 }
  0xec   :  { %v177_v62 = vmax.f32 %v166_v51, 0.0  ;;  %v252_v63 = vmax.f32 %v241_v52, 0.0 }
  0xed   :  { %v170_v38 = vpop.f32.mrf.mxu0  ;;  %v245_v39 = vpop.f32.mrf.mxu1 }
  0xee   :  { %v171_v0 = vadd.f32 %v421_v46, %v170_v38  ;;  %v246_v3 = vadd.f32 %v421_v46, %v245_v39  ;;  %v255_v12 = vmax.f32 %v177_v62, %v252_v63 }
  0xef   :  { %v172_v40 = vpop.f32.mrf.mxu0  ;;  %v247_v41 = vpop.f32.mrf.mxu1 }
  0xf0   :  { %v178_v13 = vmax.f32 %v171_v0, 0.0  ;;  %v253_v16 = vmax.f32 %v246_v3, 0.0 }
  0xf1   :  { %v173_v42 = vpop.f32.mrf.mxu0  ;;  %v248_v43 = vpop.f32.mrf.mxu1 }
  0xf2   :  { %v256_v27 = vmax.f32 %v178_v13, %v253_v16 }
  0xf3   :  { %v174_v44 = vpop.f32.mrf.mxu0  ;;  %v249_v45 = vpop.f32.mrf.mxu1 }
 0x109   :  { %v315_v53 = vpop.f32.mrf.mxu0  ;;  %v390_v54 = vpop.f32.mrf.mxu1 }
 0x10a   :  { %v316_v55 = vadd.f32 %v421_v46, %v315_v53  ;;  %v391_v56 = vadd.f32 %v421_v46, %v390_v54 }
 0x10b   :  { %v317_v57 = vpop.f32.mrf.mxu0  ;;  %v392_v58 = vpop.f32.mrf.mxu1 }
 0x10c   :  { %v329_v59 = vmax.f32 %v316_v55, 0.0  ;;  %v404_v60 = vmax.f32 %v391_v56, 0.0 }
 0x10d   :  { %v318_v1 = vpop.f32.mrf.mxu0  ;;  %v393_v2 = vpop.f32.mrf.mxu1 }
 0x10e   :  { %v407_v4 = vmax.f32 %v329_v59, %v404_v60  ;;  %v319_v5 = vadd.f32 %v421_v46, %v318_v1  ;;  %v394_v6 = vadd.f32 %v421_v46, %v393_v2 }
 0x10f   :  { %v320_v7 = vpop.f32.mrf.mxu0  ;;  %v395_v8 = vpop.f32.mrf.mxu1 }
 0x110   :  { %v410_v9 = vmax.f32 %v254_v61, %v407_v4  ;;  %v330_v10 = vmax.f32 %v319_v5, 0.0  ;;  %v405_v11 = vmax.f32 %v394_v6, 0.0 }
 0x111   :  { %v323_v14 = vpop.f32.mrf.mxu0  ;;  %v398_v15 = vpop.f32.mrf.mxu1 }
 0x112   :  { %413 = vst.msk [vmem:[%s666_s6] sm:$0xff] %vm121_vm0, %v410_v9  ;;  %v408_v17 = vmax.f32 %v330_v10, %v405_v11  ;;  %v324_v18 = vadd.f32 %v421_v46, %v323_v14  ;;  %v399_v19 = vadd.f32 %v421_v46, %v398_v15 }
 0x113   :  { %v325_v20 = vpop.f32.mrf.mxu0  ;;  %v400_v21 = vpop.f32.mrf.mxu1 }
 0x114   :  { %v411_v22 = vmax.f32 %v255_v12, %v408_v17  ;;  %v331_v23 = vmax.f32 %v324_v18, 0.0  ;;  %v406_v24 = vmax.f32 %v399_v19, 0.0 }
 0x115   :  { %v326_v25 = vpop.f32.mrf.mxu0  ;;  %v401_v26 = vpop.f32.mrf.mxu1 }
 0x116   :  { %414 = vst.msk [vmem:[%s666_s6 + $0x8] sm:$0xff] %vm121_vm0, %v411_v22  ;;  %v409_v28 = vmax.f32 %v331_v23, %v406_v24 }
 0x117   :  { %v327_v29 = vpop.f32.mrf.mxu0  ;;  %v402_v30 = vpop.f32.mrf.mxu1 }
 0x118   :  { %v412_v31 = vmax.f32 %v256_v27, %v409_v28 }
 0x11a   :  { %416 = vst.msk [vmem:[%s666_s6 + $0x10] sm:$0x3] %vm415_vm1, %v412_v31 }

// kernel: forward.9
= control target key start
LH: loop header
LB: loop body
LE: loop exit
PB: predicated region body
PF: predicated region fallthrough
CT: control target
= control target key end

     0   :  { %v356_v0 = vmov 0   ;;  %vm110_vm0 = vcmask 130048   ;;  %s496_s4 = inlined_call_operand.vmem [shape: bf16[144,16], index: 4, kind: input, shape index: {}]   ;;  %s497_s0 = inlined_call_operand.vmem [shape: bf16[8,144], index: 0, kind: input, shape index: {}]   ;;  %s498_s1 = inlined_call_operand.vmem [shape: bf16[8,144], index: 1, kind: input, shape index: {}]   ;;  %s499_s2 = inlined_call_operand.vmem [shape: bf16[8,144], index: 2, kind: input, shape index: {}]   ;;  %s500_s3 = inlined_call_operand.vmem [shape: bf16[8,144], index: 3, kind: input, shape index: {}]   ;;  %s501_s5 = inlined_call_operand.vmem [shape: f32[1,16], index: 5, kind: input, shape index: {}]   ;;  %s502_s6 = inlined_call_operand.vmem [shape: f32[8,16], index: 6, kind: output, shape index: {}]  }
   0x1   :  { %114 = vmatprep.subr.bf16.mxu0 %v356_v0  ;;  %165 = vmatprep.subr.bf16.mxu1 %v356_v0  ;;  %v397_v1 = vld [vmem:[%s496_s4 + $0x38] sm:$0xff]   ;;  %v404_v2 = vld [vmem:[%s496_s4 + $0x30] sm:$0xff]   ;;  %v413_v3 = vld [vmem:[%s496_s4 + $0x28] sm:$0xff]  }
   0x2   :  { %115 = vmatpush1.bf16.msra.mxu0 %v397_v1  ;;  %166 = vmatpush1.bf16.msra.mxu1 %v397_v1  ;;  %v43_v4 = vld [vmem:[%s497_s0] sm:$0xff]  ;;  %v343_v9 = vld [vmem:[%s496_s4 + $0x18] sm:$0xff]   ;;  %v344_v10 = vld [vmem:[%s496_s4 + $0x10] sm:$0xff]  }
   0x3   :  { %116 = vmatprep.subr.bf16.mxu0 %v356_v0  ;;  %167 = vmatprep.subr.bf16.mxu1 %v356_v0  ;;  %v155_v5 = vld [vmem:[%s498_s1] sm:$0xff]  ;;  %v318_v7 = vcombine.high %v43_v4, %v43_v4  ;;  %v345_v11 = vld [vmem:[%s496_s4 + $0x8] sm:$0xff]   ;;  %v317_v14 = vcombine.low %v43_v4, %v43_v4 }
   0x4   :  { %v342_v6 = vld [vmem:[%s496_s4 + $0x20] sm:$0xff]   ;;  %v330_v8 = vcombine.high %v155_v5, %v155_v5  ;;  %v329_v15 = vcombine.low %v155_v5, %v155_v5 }
   0x5   :  { %328 = vmatprep.mubr.msk.bf16.mxu0 %vm110_vm0, %v318_v7  ;;  %v346_v12 = vld [vmem:[%s496_s4] sm:$0xff]  }
   0x6   :  { %117 = vmatpush1.bf16.msra.mxu0 %v404_v2  ;;  %168 = vmatpush1.bf16.msra.mxu1 %v404_v2  ;;  %v347_v13 = vld [vmem:[%s496_s4 + $0x40] sm:$0xff]  }
   0x7   :  { %118 = vmatprep.subr.bf16.mxu0 %v356_v0  ;;  %169 = vmatprep.subr.bf16.mxu1 %v356_v0  ;;  %v207_v16 = vld [vmem:[%s499_s2] sm:$0xff] }
   0x8   :  { %331 = vmatprep.mubr.msk.bf16.mxu1 %vm110_vm0, %v330_v8  ;;  %v258_v17 = vld [vmem:[%s500_s3] sm:$0xff]  ;;  %v333_v18 = vcombine.high %v207_v16, %v207_v16  ;;  %v332_v20 = vcombine.low %v207_v16, %v207_v16 }
   0x9   :  { %v336_v19 = vcombine.high %v258_v17, %v258_v17  ;;  %v335_v21 = vcombine.low %v258_v17, %v258_v17  ;;  %v316_v30 = vld [vmem:[%s501_s5] ss:$0 sm:$0xff] }
   0xa   :  { %119 = vmatpush1.bf16.msra.mxu0 %v413_v3  ;;  %170 = vmatpush1.bf16.msra.mxu1 %v413_v3 }
   0xb   :  { %120 = vmatprep.subr.bf16.mxu0 %v356_v0  ;;  %171 = vmatprep.subr.bf16.mxu1 %v356_v0 }
   0xe   :  { %121 = vmatpush1.bf16.msra.mxu0 %v342_v6  ;;  %172 = vmatpush1.bf16.msra.mxu1 %v342_v6 }
   0xf   :  { %122 = vmatprep.subr.bf16.mxu0 %v356_v0  ;;  %173 = vmatprep.subr.bf16.mxu1 %v356_v0 }
  0x12   :  { %123 = vmatpush1.bf16.msra.mxu0 %v343_v9  ;;  %174 = vmatpush1.bf16.msra.mxu1 %v343_v9 }
  0x13   :  { %124 = vmatprep.subr.bf16.mxu0 %v356_v0  ;;  %175 = vmatprep.subr.bf16.mxu1 %v356_v0 }
  0x16   :  { %125 = vmatpush1.bf16.msra.mxu0 %v344_v10  ;;  %176 = vmatpush1.bf16.msra.mxu1 %v344_v10 }
  0x17   :  { %126 = vmatprep.subr.bf16.mxu0 %v356_v0  ;;  %177 = vmatprep.subr.bf16.mxu1 %v356_v0 }
  0x1a   :  { %127 = vmatpush1.bf16.msra.mxu0 %v345_v11  ;;  %178 = vmatpush1.bf16.msra.mxu1 %v345_v11 }
  0x1b   :  { %128 = vmatprep.subr.bf16.mxu0 %v356_v0  ;;  %179 = vmatprep.subr.bf16.mxu1 %v356_v0 }
  0x1e   :  { %129 = vmatpush1.bf16.msra.mxu0 %v346_v12  ;;  %180 = vmatpush1.bf16.msra.mxu1 %v346_v12 }
  0x1f   :  { %144 = vmatprep.subr.bf16.mxu0 %v356_v0  ;;  %195 = vmatprep.subr.bf16.mxu1 %v356_v0 }
  0x22   :  { %145 = vmatpush2.bf16.msra.mxu0 %v347_v13  ;;  %196 = vmatpush2.bf16.msra.mxu1 %v347_v13 }
  0x23   :  { %217 = vmatprep.subr.bf16.mxu0 %v356_v0  ;;  %268 = vmatprep.subr.bf16.mxu1 %v356_v0 }
  0x25   :  { %147 = vmatmul.mubr.bf16.vlgmr.msra.gmra.mxu0 %v317_v14  ;;  %198 = vmatmul.mubr.bf16.vlgmr.msra.gmra.mxu1 %v329_v15 }
  0x26   :  { %218 = vmatpush1.bf16.msra.mxu0 %v397_v1  ;;  %269 = vmatpush1.bf16.msra.mxu1 %v397_v1 }
  0x27   :  { %219 = vmatprep.subr.bf16.mxu0 %v356_v0  ;;  %270 = vmatprep.subr.bf16.mxu1 %v356_v0 }
  0x28   :  { %334 = vmatprep.mubr.msk.bf16.mxu0 %vm110_vm0, %v333_v18  ;;  %337 = vmatprep.mubr.msk.bf16.mxu1 %vm110_vm0, %v336_v19 }
  0x2a   :  { %220 = vmatpush1.bf16.msra.mxu0 %v404_v2  ;;  %271 = vmatpush1.bf16.msra.mxu1 %v404_v2 }
  0x2b   :  { %221 = vmatprep.subr.bf16.mxu0 %v356_v0  ;;  %272 = vmatprep.subr.bf16.mxu1 %v356_v0 }
  0x2e   :  { %222 = vmatpush1.bf16.msra.mxu0 %v413_v3  ;;  %273 = vmatpush1.bf16.msra.mxu1 %v413_v3 }
  0x2f   :  { %223 = vmatprep.subr.bf16.mxu0 %v356_v0  ;;  %274 = vmatprep.subr.bf16.mxu1 %v356_v0 }
  0x32   :  { %224 = vmatpush1.bf16.msra.mxu0 %v342_v6  ;;  %275 = vmatpush1.bf16.msra.mxu1 %v342_v6 }
  0x33   :  { %225 = vmatprep.subr.bf16.mxu0 %v356_v0  ;;  %276 = vmatprep.subr.bf16.mxu1 %v356_v0 }
  0x36   :  { %226 = vmatpush1.bf16.msra.mxu0 %v343_v9  ;;  %277 = vmatpush1.bf16.msra.mxu1 %v343_v9 }
  0x37   :  { %227 = vmatprep.subr.bf16.mxu0 %v356_v0  ;;  %278 = vmatprep.subr.bf16.mxu1 %v356_v0 }
  0x3a   :  { %228 = vmatpush1.bf16.msra.mxu0 %v344_v10  ;;  %279 = vmatpush1.bf16.msra.mxu1 %v344_v10 }
  0x3b   :  { %229 = vmatprep.subr.bf16.mxu0 %v356_v0  ;;  %280 = vmatprep.subr.bf16.mxu1 %v356_v0 }
  0x3e   :  { %230 = vmatpush1.bf16.msra.mxu0 %v345_v11  ;;  %281 = vmatpush1.bf16.msra.mxu1 %v345_v11 }
  0x3f   :  { %231 = vmatprep.subr.bf16.mxu0 %v356_v0  ;;  %282 = vmatprep.subr.bf16.mxu1 %v356_v0 }
  0x42   :  { %232 = vmatpush1.bf16.msra.mxu0 %v346_v12  ;;  %283 = vmatpush1.bf16.msra.mxu1 %v346_v12 }
  0x43   :  { %247 = vmatprep.subr.bf16.mxu0 %v356_v0  ;;  %298 = vmatprep.subr.bf16.mxu1 %v356_v0 }
  0x46   :  { %248 = vmatpush2.bf16.msra.mxu0 %v347_v13  ;;  %299 = vmatpush2.bf16.msra.mxu1 %v347_v13 }
  0x49   :  { %250 = vmatmul.mubr.bf16.vlgmr.msra.gmra.mxu0 %v332_v20  ;;  %301 = vmatmul.mubr.bf16.vlgmr.msra.gmra.mxu1 %v335_v21 }
  0xe5   :  { %v148_v22 = vpop.f32.mrf.mxu0  ;;  %v199_v23 = vpop.f32.mrf.mxu1 }
  0xe6   :  { %v149_v31 = vadd.f32 %v316_v30, %v148_v22  ;;  %v200_v32 = vadd.f32 %v316_v30, %v199_v23 }
  0xe7   :  { %v150_v24 = vpop.f32.mrf.mxu0  ;;  %v201_v25 = vpop.f32.mrf.mxu1 }
  0xe8   :  { %v154_v35 = vmax.f32 %v149_v31, 0.0  ;;  %v205_v36 = vmax.f32 %v200_v32, 0.0 }
  0xe9   :  { %v151_v26 = vpop.f32.mrf.mxu0  ;;  %v202_v27 = vpop.f32.mrf.mxu1 }
  0xea   :  { %v206_v45 = vmax.f32 %v154_v35, %v205_v36 }
  0xeb   :  { %v152_v28 = vpop.f32.mrf.mxu0  ;;  %v203_v29 = vpop.f32.mrf.mxu1 }
 0x109   :  { %v251_v33 = vpop.f32.mrf.mxu0  ;;  %v302_v34 = vpop.f32.mrf.mxu1 }
 0x10a   :  { %v252_v37 = vadd.f32 %v316_v30, %v251_v33  ;;  %v303_v38 = vadd.f32 %v316_v30, %v302_v34 }
 0x10b   :  { %v253_v39 = vpop.f32.mrf.mxu0  ;;  %v304_v40 = vpop.f32.mrf.mxu1 }
 0x10c   :  { %v257_v41 = vmax.f32 %v252_v37, 0.0  ;;  %v308_v42 = vmax.f32 %v303_v38, 0.0 }
 0x10d   :  { %v254_v43 = vpop.f32.mrf.mxu0  ;;  %v305_v44 = vpop.f32.mrf.mxu1 }
 0x10e   :  { %v309_v46 = vmax.f32 %v257_v41, %v308_v42 }
 0x10f   :  { %v255_v47 = vpop.f32.mrf.mxu0  ;;  %v306_v48 = vpop.f32.mrf.mxu1 }
 0x110   :  { %v310_v49 = vmax.f32 %v206_v45, %v309_v46 }
 0x112   :  { %311 = vst.msk [vmem:[%s502_s6] sm:$0xff] %vm110_vm0, %v310_v49 }

// kernel: forward.11
= control target key start
LH: loop header
LB: loop body
LE: loop exit
PB: predicated region body
PF: predicated region fallthrough
CT: control target
= control target key end

     0   :  { %v1420_v8 = vmov 0   ;;  %vm257_vm0 = vcmask 523264   ;;  %s1783_s0 = inlined_call_operand.vmem [shape: bf16[2,64], index: 0, kind: input, shape index: {}]   ;;  %s1784_s1 = inlined_call_operand.vmem [shape: bf16[64,1024], index: 1, kind: input, shape index: {}]   ;;  %s1785_s2 = inlined_call_operand.vmem [shape: f32[1,1024], index: 2, kind: input, shape index: {}]   ;;  %s1786_s3 = inlined_call_operand.vmem [shape: bf16[1024,10], index: 3, kind: input, shape index: {}]   ;;  %s1787_s4 = inlined_call_operand.vmem [shape: f32[1,10], index: 4, kind: input, shape index: {}]   ;;  %s1788_s5 = inlined_call_operand.hbm [shape: f32[2,10], index: 5, kind: output, shape index: {}]  }
   0x1   :  { %v47_v0 = vld [vmem:[%s1784_s1 + $0xc0] sm:$0xff]  ;;  %v48_v2 = vld [vmem:[%s1784_s1 + $0xc8] sm:$0xff]  ;;  %293 = vmatprep.mubr.bf16.mxu0 %v1420_v8  ;;  %334 = vmatprep.mubr.bf16.mxu1 %v1420_v8  ;;  %v49_v31 = vld [vmem:[%s1784_s1 + $0xd0] sm:$0xff] }
   0x2   :  { %v51_v1 = vld [vmem:[%s1784_s1 + $0xe0] sm:$0xff]  ;;  %v52_v4 = vld [vmem:[%s1784_s1 + $0xe8] sm:$0xff]  ;;  %v53_v32 = vld [vmem:[%s1784_s1 + $0xf0] sm:$0xff] }
   0x3   :  { %v1164_v3 = vcombine.high %v47_v0, %v51_v1  ;;  %v1163_v5 = vcombine.low %v47_v0, %v51_v1  ;;  %v39_v6 = vld [vmem:[%s1784_s1 + $0x80] sm:$0xff]  ;;  %v1166_v9 = vcombine.high %v48_v2, %v52_v4  ;;  %v1165_v10 = vcombine.low %v48_v2, %v52_v4  ;;  %v40_v12 = vld [vmem:[%s1784_s1 + $0x88] sm:$0xff]  ;;  %v50_v33 = vld [vmem:[%s1784_s1 + $0xd8] sm:$0xff] }
   0x4   :  { %v43_v7 = vld [vmem:[%s1784_s1 + $0xa0] sm:$0xff]  ;;  %v44_v13 = vld [vmem:[%s1784_s1 + $0xa8] sm:$0xff]  ;;  %v54_v34 = vld [vmem:[%s1784_s1 + $0xf8] sm:$0xff]  ;;  %v1168_v38 = vcombine.high %v49_v31, %v53_v32  ;;  %v1167_v44 = vcombine.low %v49_v31, %v53_v32 }
   0x5   :  { %v1156_v11 = vcombine.high %v39_v6, %v43_v7  ;;  %v31_v14 = vld [vmem:[%s1784_s1 + $0x40] sm:$0xff]  ;;  %269 = vmatprep.subr.bf16.mxu0 %v1164_v3  ;;  %v1158_v15 = vcombine.high %v40_v12, %v44_v13  ;;  %v32_v17 = vld [vmem:[%s1784_s1 + $0x48] sm:$0xff]  ;;  %310 = vmatprep.subr.bf16.mxu1 %v1166_v9  ;;  %v1155_v19 = vcombine.low %v39_v6, %v43_v7  ;;  %v41_v36 = vld [vmem:[%s1784_s1 + $0x90] sm:$0xff] }
   0x6   :  { %v35_v16 = vld [vmem:[%s1784_s1 + $0x60] sm:$0xff]  ;;  %v36_v18 = vld [vmem:[%s1784_s1 + $0x68] sm:$0xff]  ;;  %270 = vmatpush1.bf16.msra.mxu0 %v1163_v5  ;;  %311 = vmatpush1.bf16.msra.mxu1 %v1165_v10  ;;  %v1157_v20 = vcombine.low %v40_v12, %v44_v13  ;;  %v45_v39 = vld [vmem:[%s1784_s1 + $0xb0] sm:$0xff]  ;;  %v1170_v41 = vcombine.high %v50_v33, %v54_v34  ;;  %v1169_v46 = vcombine.low %v50_v33, %v54_v34 }
   0x7   :  { %271 = vmatprep.subr.bf16.mxu0 %v1156_v11  ;;  %v1148_v21 = vcombine.high %v31_v14, %v35_v16  ;;  %312 = vmatprep.subr.bf16.mxu1 %v1158_v15  ;;  %v1150_v22 = vcombine.high %v32_v17, %v36_v18  ;;  %v23_v23 = vld [vmem:[%s1784_s1] sm:$0xff]  ;;  %v24_v25 = vld [vmem:[%s1784_s1 + $0x8] sm:$0xff]  ;;  %v1147_v27 = vcombine.low %v31_v14, %v35_v16  ;;  %v42_v42 = vld [vmem:[%s1784_s1 + $0x98] sm:$0xff] }
   0x8   :  { %v27_v24 = vld [vmem:[%s1784_s1 + $0x20] sm:$0xff]  ;;  %v28_v26 = vld [vmem:[%s1784_s1 + $0x28] sm:$0xff]  ;;  %v1149_v28 = vcombine.low %v32_v17, %v36_v18  ;;  %v46_v43 = vld [vmem:[%s1784_s1 + $0xb8] sm:$0xff]  ;;  %v1160_v47 = vcombine.high %v41_v36, %v45_v39  ;;  %v1159_v52 = vcombine.low %v41_v36, %v45_v39 }
   0x9   :  { %v1140_v29 = vcombine.high %v23_v23, %v27_v24  ;;  %v1142_v30 = vcombine.high %v24_v25, %v28_v26  ;;  %v1139_v35 = vcombine.low %v23_v23, %v27_v24  ;;  %v1141_v37 = vcombine.low %v24_v25, %v28_v26  ;;  %v22_v40 = vld [vmem:[%s1783_s0] sm:$0x1]  ;;  %v33_v45 = vld [vmem:[%s1784_s1 + $0x50] sm:$0xff]  ;;  %v34_v50 = vld [vmem:[%s1784_s1 + $0x58] sm:$0xff] }
   0xa   :  { %272 = vmatpush1.bf16.msra.mxu0 %v1155_v19  ;;  %313 = vmatpush1.bf16.msra.mxu1 %v1157_v20  ;;  %v37_v48 = vld [vmem:[%s1784_s1 + $0x70] sm:$0xff]  ;;  %v1162_v49 = vcombine.high %v42_v42, %v46_v43  ;;  %v38_v51 = vld [vmem:[%s1784_s1 + $0x78] sm:$0xff]  ;;  %v1161_v54 = vcombine.low %v42_v42, %v46_v43  ;;  %v1338_v10 = vld [vmem:[%s1786_s3 + $0x68] sm:$0xff]  }
   0xb   :  { %273 = vmatprep.subr.bf16.mxu0 %v1148_v21  ;;  %314 = vmatprep.subr.bf16.mxu1 %v1150_v22  ;;  %v25_v53 = vld [vmem:[%s1784_s1 + $0x10] sm:$0xff]  ;;  %v1152_v55 = vcombine.high %v33_v45, %v37_v48  ;;  %v1154_v57 = vcombine.high %v34_v50, %v38_v51  ;;  %v26_v58 = vld [vmem:[%s1784_s1 + $0x18] sm:$0xff]  ;;  %v1151_v60 = vcombine.low %v33_v45, %v37_v48  ;;  %v1339_v11 = vld [vmem:[%s1786_s3 + $0xe8] sm:$0xff]  }
   0xc   :  { %v29_v56 = vld [vmem:[%s1784_s1 + $0x30] sm:$0xff]  ;;  %v30_v59 = vld [vmem:[%s1784_s1 + $0x38] sm:$0xff]  ;;  %v1153_v61 = vcombine.low %v34_v50, %v38_v51  ;;  %v1340_v12 = vld [vmem:[%s1786_s3 + $0x28] sm:$0xff]  }
   0xd   :  { %v1144_v62 = vcombine.high %v25_v53, %v29_v56  ;;  %v1146_v63 = vcombine.high %v26_v58, %v30_v59  ;;  %v1143_v0 = vcombine.low %v25_v53, %v29_v56  ;;  %v1330_v1 = vld [vmem:[%s1786_s3 + $0x78] sm:$0xff]   ;;  %v1145_v2 = vcombine.low %v26_v58, %v30_v59  ;;  %v1334_v6 = vld [vmem:[%s1786_s3 + $0x70] sm:$0xff]   ;;  %v1341_v13 = vld [vmem:[%s1786_s3 + $0xa8] sm:$0xff]  }
   0xe   :  { %274 = vmatpush1.bf16.msra.mxu0 %v1147_v27  ;;  %315 = vmatpush1.bf16.msra.mxu1 %v1149_v28  ;;  %v1331_v3 = vld [vmem:[%s1786_s3 + $0xf8] sm:$0xff]   ;;  %v1335_v7 = vld [vmem:[%s1786_s3 + $0xf0] sm:$0xff]   ;;  %v1342_v14 = vld [vmem:[%s1786_s3 + $0x60] sm:$0xff]  }
   0xf   :  { %275 = vmatprep.subr.bf16.mxu0 %v1140_v29  ;;  %316 = vmatprep.subr.bf16.mxu1 %v1142_v30  ;;  %v1332_v4 = vld [vmem:[%s1786_s3 + $0x38] sm:$0xff]   ;;  %v1337_v9 = vld [vmem:[%s1786_s3 + $0xb0] sm:$0xff]   ;;  %v1343_v15 = vld [vmem:[%s1786_s3 + $0xe0] sm:$0xff]  }
  0x10   :  { %v1333_v5 = vld [vmem:[%s1786_s3 + $0xb8] sm:$0xff]   ;;  %v1344_v16 = vld [vmem:[%s1786_s3 + $0x20] sm:$0xff]   ;;  %v1350_v22 = vld [vmem:[%s1786_s3 + $0x50] sm:$0xff]  }
  0x11   :  { %v1345_v17 = vld [vmem:[%s1786_s3 + $0xa0] sm:$0xff]   ;;  %v1346_v18 = vld [vmem:[%s1786_s3 + $0x58] sm:$0xff]   ;;  %v1351_v23 = vld [vmem:[%s1786_s3 + $0xd0] sm:$0xff]  }
  0x12   :  { %276 = vmatpush1.bf16.msra.mxu0 %v1139_v35  ;;  %317 = vmatpush1.bf16.msra.mxu1 %v1141_v37  ;;  %v1347_v19 = vld [vmem:[%s1786_s3 + $0xd8] sm:$0xff]   ;;  %v1352_v24 = vld [vmem:[%s1786_s3 + $0x10] sm:$0xff]   ;;  %v1354_v26 = vld [vmem:[%s1786_s3 + $0x48] sm:$0xff]  }
  0x13   :  { %351 = vmatprep.subr.bf16.mxu0 %v1168_v38  ;;  %392 = vmatprep.subr.bf16.mxu1 %v1170_v41  ;;  %v1348_v20 = vld [vmem:[%s1786_s3 + $0x18] sm:$0xff]   ;;  %v1353_v25 = vld [vmem:[%s1786_s3 + $0x90] sm:$0xff]   ;;  %v1355_v27 = vld [vmem:[%s1786_s3 + $0xc8] sm:$0xff]  }
  0x14   :  { %v1349_v21 = vld [vmem:[%s1786_s3 + $0x98] sm:$0xff]  }
  0x15   :  { %1171 = vmatmul.mubr.msk.bf16.vlgmr.msra.gmra.mxu0 %vm257_vm0, %v22_v40  ;;  %1172 = vmatmul.mubr.msk.bf16.vlgmr.msra.gmra.mxu1 %vm257_vm0, %v22_v40 }
  0x16   :  { %352 = vmatpush1.bf16.msra.mxu0 %v1167_v44  ;;  %393 = vmatpush1.bf16.msra.mxu1 %v1169_v46 }
  0x17   :  { %353 = vmatprep.subr.bf16.mxu0 %v1160_v47  ;;  %394 = vmatprep.subr.bf16.mxu1 %v1162_v49 }
  0x18   :  { %375 = vmatprep.mubr.bf16.mxu0 %v1420_v8  ;;  %416 = vmatprep.mubr.bf16.mxu1 %v1420_v8  ;;  %v1336_v8 = vld [vmem:[%s1786_s3 + $0x30] sm:$0xff]  }
  0x1a   :  { %354 = vmatpush1.bf16.msra.mxu0 %v1159_v52  ;;  %395 = vmatpush1.bf16.msra.mxu1 %v1161_v54 }
  0x1b   :  { %355 = vmatprep.subr.bf16.mxu0 %v1152_v55  ;;  %396 = vmatprep.subr.bf16.mxu1 %v1154_v57 }
  0x1e   :  { %356 = vmatpush1.bf16.msra.mxu0 %v1151_v60  ;;  %397 = vmatpush1.bf16.msra.mxu1 %v1153_v61 }
  0x1f   :  { %357 = vmatprep.subr.bf16.mxu0 %v1144_v62  ;;  %398 = vmatprep.subr.bf16.mxu1 %v1146_v63 }
  0x22   :  { %358 = vmatpush1.bf16.msra.mxu0 %v1143_v0  ;;  %399 = vmatpush1.bf16.msra.mxu1 %v1145_v2 }
  0x23   :  { %1240 = vmatprep.subr.bf16.mxu0 %v1330_v1  ;;  %1262 = vmatprep.subr.bf16.mxu1 %v1331_v3 }
  0x25   :  { %1173 = vmatmul.mubr.msk.bf16.vlgmr.msra.gmra.mxu0 %vm257_vm0, %v22_v40  ;;  %1174 = vmatmul.mubr.msk.bf16.vlgmr.msra.gmra.mxu1 %vm257_vm0, %v22_v40 }
  0x26   :  { %1241 = vmatpush3.bf16.msra.mxu0 %v1332_v4  ;;  %1263 = vmatpush3.bf16.msra.mxu1 %v1333_v5 }
  0x27   :  { %1242 = vmatprep.subr.bf16.mxu0 %v1334_v6  ;;  %1264 = vmatprep.subr.bf16.mxu1 %v1335_v7 }
  0x2a   :  { %1243 = vmatpush3.bf16.msra.mxu0 %v1336_v8  ;;  %1265 = vmatpush3.bf16.msra.mxu1 %v1337_v9 }
  0x2b   :  { %1244 = vmatprep.subr.bf16.mxu0 %v1338_v10  ;;  %1266 = vmatprep.subr.bf16.mxu1 %v1339_v11 }
  0x2e   :  { %1245 = vmatpush3.bf16.msra.mxu0 %v1340_v12  ;;  %1267 = vmatpush3.bf16.msra.mxu1 %v1341_v13 }
  0x2f   :  { %1246 = vmatprep.subr.bf16.mxu0 %v1342_v14  ;;  %1268 = vmatprep.subr.bf16.mxu1 %v1343_v15 }
  0x32   :  { %1247 = vmatpush3.bf16.msra.mxu0 %v1344_v16  ;;  %1269 = vmatpush3.bf16.msra.mxu1 %v1345_v17 }
  0x33   :  { %1248 = vmatprep.subr.bf16.mxu0 %v1346_v18  ;;  %1270 = vmatprep.subr.bf16.mxu1 %v1347_v19 }
  0x36   :  { %1249 = vmatpush3.bf16.msra.mxu0 %v1348_v20  ;;  %1271 = vmatpush3.bf16.msra.mxu1 %v1349_v21 }
  0x37   :  { %1250 = vmatprep.subr.bf16.mxu0 %v1350_v22  ;;  %1272 = vmatprep.subr.bf16.mxu1 %v1351_v23 }
  0x3a   :  { %1251 = vmatpush3.bf16.msra.mxu0 %v1352_v24  ;;  %1273 = vmatpush3.bf16.msra.mxu1 %v1353_v25 }
  0x3b   :  { %1252 = vmatprep.subr.bf16.mxu0 %v1354_v26  ;;  %1274 = vmatprep.subr.bf16.mxu1 %v1355_v27 }
  0x3c   :  { %10 = vsyncpa [#allocation3], 0  ;;  %v1356_v28 = vld [vmem:[%s1786_s3 + $0x8] sm:$0xff]   ;;  %v1358_v30 = vld [vmem:[%s1786_s3 + $0x40] sm:$0xff]   ;;  %v57_v36 = vlaneseq  ;;  %vm1112_vm1 = vcmask 74752  }
  0x3d   :  { %v1357_v29 = vld [vmem:[%s1786_s3 + $0x88] sm:$0xff]   ;;  %v1359_v31 = vld [vmem:[%s1786_s3 + $0xc0] sm:$0xff]   ;;  %v1362_v34 = vld [vmem:[%s1786_s3 + $0x178] sm:$0xff]  }
  0x3e   :  { %1253 = vmatpush3.bf16.msra.mxu0 %v1356_v28  ;;  %1275 = vmatpush3.bf16.msra.mxu1 %v1357_v29  ;;  %v1360_v32 = vld [vmem:[%s1786_s3] sm:$0xff]   ;;  %v1363_v35 = vld [vmem:[%s1786_s3 + $0x1f8] sm:$0xff]   ;;  %v1661_v37 = vshrl.u32 %v57_v36, 7  ;;  %v1366_v0 = vld [vmem:[%s1786_s3 + $0x170] sm:$0xff]  }
  0x3f   :  { %v1361_v33 = vld [vmem:[%s1786_s3 + $0x80] sm:$0xff]   ;;  %1254 = vmatprep.subr.bf16.mxu0 %v1358_v30  ;;  %1276 = vmatprep.subr.bf16.mxu1 %v1359_v31  ;;  %v1364_v59 = vld [vmem:[%s1786_s3 + $0x138] sm:$0xff]   ;;  %v1367_v2 = vld [vmem:[%s1786_s3 + $0x1f0] sm:$0xff]  }
  0x40   :  { %v59_v38 = vsub.s32 0, %v1661_v37  ;;  %v67_v39 = vsub.s32 2, %v1661_v37  ;;  %v1668_v40 = vld [vmem:[%s1785_s2] sm:$0xff]  ;;  %v63_v41 = vsub.s32 1, %v1661_v37  ;;  %v71_v42 = vsub.s32 3, %v1661_v37  ;;  %v1365_v63 = vld [vmem:[%s1786_s3 + $0x1b8] sm:$0xff]  }
  0x41   :  { %v1368_v3 = vld [vmem:[%s1786_s3 + $0x130] sm:$0xff]   ;;  %v1370_v5 = vld [vmem:[%s1786_s3 + $0x168] sm:$0xff]   ;;  %v79_v7 = vsub.s32 5, %v1661_v37  ;;  %v87_v8 = vsub.s32 7, %v1661_v37  ;;  %v1374_v11 = vld [vmem:[%s1786_s3 + $0x160] sm:$0xff]  }
  0x42   :  { %1255 = vmatpush3.bf16.msra.mxu0 %v1360_v32  ;;  %1277 = vmatpush3.bf16.msra.mxu1 %v1361_v33  ;;  %v60_v43 = vrot.slane %v1668_v40, %v59_v38  ;;  %v68_v44 = vrot.slane %v1668_v40, %v67_v39  ;;  %v64_v45 = vrot.slane %v1668_v40, %v63_v41  ;;  %v1369_v4 = vld [vmem:[%s1786_s3 + $0x1b0] sm:$0xff]   ;;  %v1371_v6 = vld [vmem:[%s1786_s3 + $0x1e8] sm:$0xff]   ;;  %v1375_v12 = vld [vmem:[%s1786_s3 + $0x1e0] sm:$0xff]   ;;  %v75_v38 = vsub.s32 4, %v1661_v37 }
  0x43   :  { %1284 = vmatprep.subr.bf16.mxu0 %v1362_v34  ;;  %1306 = vmatprep.subr.bf16.mxu1 %v1363_v35  ;;  %v72_v47 = vrot.slane %v1668_v40, %v71_v42  ;;  %v1372_v9 = vld [vmem:[%s1786_s3 + $0x128] sm:$0xff]   ;;  %v80_v13 = vrot.slane %v1668_v40, %v79_v7  ;;  %v88_v15 = vrot.slane %v1668_v40, %v87_v8  ;;  %v1376_v16 = vld [vmem:[%s1786_s3 + $0x120] sm:$0xff]   ;;  %v1378_v19 = vld [vmem:[%s1786_s3 + $0x158] sm:$0xff]   ;;  %v83_v35 = vsub.s32 6, %v1661_v37 }
  0x44   :  { %v1373_v10 = vld [vmem:[%s1786_s3 + $0x1a8] sm:$0xff]   ;;  %v1377_v18 = vld [vmem:[%s1786_s3 + $0x1a0] sm:$0xff]   ;;  %v1379_v21 = vld [vmem:[%s1786_s3 + $0x1d8] sm:$0xff]  }
  0x45   :  { %v1380_v26 = vld [vmem:[%s1786_s3 + $0x118] sm:$0xff]   ;;  %v1382_v30 = vld [vmem:[%s1786_s3 + $0x150] sm:$0xff]   ;;  %v1386_v41 = vld [vmem:[%s1786_s3 + $0x148] sm:$0xff]  }
  0x46   :  { %v1381_v29 = vld [vmem:[%s1786_s3 + $0x198] sm:$0xff]   ;;  %v1383_v33 = vld [vmem:[%s1786_s3 + $0x1d0] sm:$0xff]   ;;  %v1387_v42 = vld [vmem:[%s1786_s3 + $0x1c8] sm:$0xff]  }
  0x47   :  { %v1384_v36 = vld [vmem:[%s1786_s3 + $0x110] sm:$0xff]   ;;  %v1388_v37 = vld [vmem:[%s1786_s3 + $0x108] sm:$0xff]  }
  0x48   :  { %v1385_v39 = vld [vmem:[%s1786_s3 + $0x190] sm:$0xff]  }
  0xd5   :  { %v295_v46 = vpop.f32.mrf.mxu0  ;;  %v336_v48 = vpop.f32.mrf.mxu1 }
  0xd6   :  { %v296_v49 = vadd.f32 %v295_v46, %v60_v43  ;;  %v337_v50 = vadd.f32 %v336_v48, %v68_v44  ;;  %v84_v43 = vrot.slane %v1668_v40, %v83_v35  ;;  %v76_v44 = vrot.slane %v1668_v40, %v75_v38  ;;  %v1390_v46 = vld [vmem:[%s1786_s3 + $0x140] sm:$0xff]  }
  0xd7   :  { %v297_v51 = vpop.f32.mrf.mxu0  ;;  %v338_v53 = vpop.f32.mrf.mxu1  ;;  %v1392_v40 = vld [vmem:[%s1786_s3 + $0x100] sm:$0xff]  }
  0xd8   :  { %v298_v52 = vadd.f32 %v297_v51, %v64_v45  ;;  %v339_v54 = vadd.f32 %v338_v53, %v72_v47  ;;  %v427_v56 = vpack.c.bf16 %v337_v50, %v337_v50  ;;  %v425_v60 = vpack.c.bf16 %v296_v49, %v296_v49  ;;  %v1389_v45 = vld [vmem:[%s1786_s3 + $0x188] sm:$0xff]   ;;  %v1391_v47 = vld [vmem:[%s1786_s3 + $0x1c0] sm:$0xff]  }
  0xd9   :  { %v299_v55 = vpop.f32.mrf.mxu0  ;;  %v340_v58 = vpop.f32.mrf.mxu1  ;;  %v1393_v50 = vld [vmem:[%s1786_s3 + $0x180] sm:$0xff]   ;;  %s1421_s3 = smov [#allocation2]  }
  0xda   :  { %v426_v57 = vpack.c.bf16 %v298_v52, %v298_v52  ;;  %v428_v61 = vpack.c.bf16 %v339_v54, %v339_v54 }
  0xdb   :  { %v300_v62 = vpop.f32.mrf.mxu0  ;;  %v341_v1 = vpop.f32.mrf.mxu1 }
  0xdc   :  { %984 = vmatprep.mubr.bf16.mxu0 %v426_v57  ;;  %1024 = vmatprep.mubr.bf16.mxu1 %v428_v61  ;;  %v1175_v62 = vld [vmem:[%s1787_s4] ss:$0 sm:$0xff]  ;;  %s1131_s4 = sshll.u32 %s1421_s3, 4  ;;  %s1132_s4 = int_to_ptr.vmem [resolvable:$true] %s1131_s4 }
  0xdd   :  { %985 = vmatmul.mubr.bf16.vlgmr.msra.gmra.mxu0 %v425_v60  ;;  %1025 = vmatmul.mubr.bf16.vlgmr.msra.gmra.mxu1 %v427_v56  ;;  %s1398_s27 = scalar_lea.vmem %s1132_s4, 32  ;;  %p1403_p1 = scmp.lt.s32.totalorder %s1132_s4, %s1132_s4 }
  0xde   :  { %1285 = vmatpush3.bf16.msra.mxu0 %v1364_v59  ;;  %1307 = vmatpush3.bf16.msra.mxu1 %v1365_v63  ;;  %p1399_p0 = scmp.ne.s32.totalorder %s1132_s4, %s1398_s27  ;;  %p1404_p2 = scmp.lt.s32.totalorder %s1398_s27, %s1398_s27 }
  0xdf   :  { %1286 = vmatprep.subr.bf16.mxu0 %v1366_v0  ;;  %1308 = vmatprep.subr.bf16.mxu1 %v1367_v2 }
  0xe0   :  { %p1405_p3 = por %p1404_p2, %p1403_p1 }
  0xe2   :  { %1287 = vmatpush3.bf16.msra.mxu0 %v1368_v3  ;;  %1309 = vmatpush3.bf16.msra.mxu1 %v1369_v4  ;;  %p1406_p4 = pnand %p1405_p3, %p1399_p0 }
  0xe3   :  { %1288 = vmatprep.subr.bf16.mxu0 %v1370_v5  ;;  %1310 = vmatprep.subr.bf16.mxu1 %v1371_v6 }
  0xe5   :  { %v377_v14 = vpop.f32.mrf.mxu0  ;;  %v418_v17 = vpop.f32.mrf.mxu1 }
  0xe6   :  { %1289 = vmatpush3.bf16.msra.mxu0 %v1372_v9  ;;  %1311 = vmatpush3.bf16.msra.mxu1 %v1373_v10  ;;  %v419_v48 = vadd.f32 %v418_v17, %v84_v43  ;;  %v378_v49 = vadd.f32 %v377_v14, %v76_v44 }
  0xe7   :  { %1290 = vmatprep.subr.bf16.mxu0 %v1374_v11  ;;  %v379_v20 = vpop.f32.mrf.mxu0  ;;  %1312 = vmatprep.subr.bf16.mxu1 %v1375_v12  ;;  %v420_v23 = vpop.f32.mrf.mxu1 }
  0xe8   :  { %v380_v22 = vadd.f32 %v379_v20, %v80_v13  ;;  %v421_v25 = vadd.f32 %v420_v23, %v88_v15  ;;  %v431_v51 = vpack.c.bf16 %v419_v48, %v419_v48  ;;  %v429_v52 = vpack.c.bf16 %v378_v49, %v378_v49 }
  0xe9   :  { %v381_v24 = vpop.f32.mrf.mxu0  ;;  %v422_v28 = vpop.f32.mrf.mxu1 }
  0xea   :  { %1291 = vmatpush3.bf16.msra.mxu0 %v1376_v16  ;;  %v430_v27 = vpack.c.bf16 %v380_v22, %v380_v22  ;;  %1313 = vmatpush3.bf16.msra.mxu1 %v1377_v18  ;;  %v432_v31 = vpack.c.bf16 %v421_v25, %v421_v25 }
  0xeb   :  { %1292 = vmatprep.subr.bf16.mxu0 %v1378_v19  ;;  %v382_v32 = vpop.f32.mrf.mxu0  ;;  %1314 = vmatprep.subr.bf16.mxu1 %v1379_v21  ;;  %v423_v34 = vpop.f32.mrf.mxu1 }
  0xec   :  { %1064 = vmatprep.mubr.bf16.mxu0 %v430_v27  ;;  %1104 = vmatprep.mubr.bf16.mxu1 %v432_v31 }
  0xee   :  { %1293 = vmatpush3.bf16.msra.mxu0 %v1380_v26  ;;  %1315 = vmatpush3.bf16.msra.mxu1 %v1381_v29 }
  0xef   :  { %1294 = vmatprep.subr.bf16.mxu0 %v1382_v30  ;;  %1316 = vmatprep.subr.bf16.mxu1 %v1383_v33 }
  0xf2   :  { %1295 = vmatpush3.bf16.msra.mxu0 %v1384_v36  ;;  %1317 = vmatpush3.bf16.msra.mxu1 %v1385_v39 }
  0xf3   :  { %1296 = vmatprep.subr.bf16.mxu0 %v1386_v41  ;;  %1318 = vmatprep.subr.bf16.mxu1 %v1387_v42 }
  0xf6   :  { %1297 = vmatpush3.bf16.msra.mxu0 %v1388_v37  ;;  %1319 = vmatpush3.bf16.msra.mxu1 %v1389_v45 }
  0xf7   :  { %1298 = vmatprep.subr.bf16.mxu0 %v1390_v46  ;;  %1320 = vmatprep.subr.bf16.mxu1 %v1391_v47 }
  0xfa   :  { %1299 = vmatpush3.bf16.msra.mxu0 %v1392_v40  ;;  %1321 = vmatpush3.bf16.msra.mxu1 %v1393_v50 }
  0xfd   :  { %1065 = vmatmul.mubr.bf16.vlgmr.msra.gmra.mxu0 %v429_v52  ;;  %1105 = vmatmul.mubr.bf16.vlgmr.msra.gmra.mxu1 %v431_v51 }
 0x19d   :  { %v1256_v53 = vpop.f32.mrf.mxu0  ;;  %v1278_v54 = vpop.f32.mrf.mxu1 }
 0x19f   :  { %v1257_v55 = vpop.f32.mrf.mxu0  ;;  %v1279_v56 = vpop.f32.mrf.mxu1 }
 0x1a0   :  { %v1258_v61 = vadd.f32 %v1257_v55, %v1256_v53  ;;  %v1280_v1 = vadd.f32 %v1279_v56, %v1278_v54 }
 0x1a1   :  { %v1259_v57 = vpop.f32.mrf.mxu0  ;;  %v1281_v58 = vpop.f32.mrf.mxu1 }
 0x1a2   :  { %v987_v63 = vadd.f32 %v1258_v61, %v1175_v62 }
 0x1a3   :  { %v1260_v59 = vpop.f32.mrf.mxu0  ;;  %v1282_v60 = vpop.f32.mrf.mxu1 }
 0x1a4   :  { %v1027_v4 = vadd.f32 %v1280_v1, %v987_v63 }
 0x1bd   :  { %v1300_v0 = vpop.f32.mrf.mxu0  ;;  %v1322_v2 = vpop.f32.mrf.mxu1 }
 0x1bf   :  { %v1301_v3 = vpop.f32.mrf.mxu0  ;;  %v1323_v6 = vpop.f32.mrf.mxu1 }
 0x1c0   :  { %v1302_v5 = vadd.f32 %v1301_v3, %v1300_v0  ;;  %v1324_v9 = vadd.f32 %v1323_v6, %v1322_v2 }
 0x1c1   :  { %v1303_v7 = vpop.f32.mrf.mxu0  ;;  %v1325_v10 = vpop.f32.mrf.mxu1 }
 0x1c2   :  { %v1067_v8 = vadd.f32 %v1302_v5, %v1027_v4 }
 0x1c3   :  { %v1304_v11 = vpop.f32.mrf.mxu0  ;;  %v1326_v12 = vpop.f32.mrf.mxu1 }
 0x1c4   :  { %v1107_v13 = vadd.f32 %v1324_v9, %v1067_v8 }
 0x1c6   :  { %v1113_v14 = vsel %vm1112_vm1, %v1107_v13, -inf }
 0x1c7   :  { %1114 = vmax.xlane.f32.xlu0 %v1113_v14 }
 0x250   :  { %v1115_v15 = vpop.xlane.xlu0 %1114 }
 0x251   :  { %v1116_v16 = vsub.f32 %v1107_v13, %v1115_v15 }
 0x253   :  { %v1117_v17 = vmul.f32 1.442695, %v1116_v16 }
 0x255   :  { %1394 = vpow2.f32 %v1117_v17 }
 0x262   :  { %v1395_v18 = vpop.eup %1394 }
 0x263   :  { %v1119_v19 = vsel %vm1112_vm1, %v1395_v18, 0.0 }
 0x264   :  { %1120 = vadd.xlane.f32.xlu0 %v1119_v19 }
 0x2ed   :  { %v1121_v20 = vpop.xlane.xlu0 %1120 }
 0x2ee   :  { %1396 = vrcp.f32 %v1121_v20 }
 0x2fb   :  { %v1397_v21 = vpop.eup %1396 }
 0x2fc   :  { %v1123_v22 = vmul.f32 %v1397_v21, %v1395_v18 }
 0x2fe   :  { %1124 = vst.msk [vmem:[#allocation2] sm:$0x3] %vm1112_vm1, %v1123_v22 }
 0x2ff   :  { %1409 = shalt.err (!%p1406_p4)
}
 0x300   :  { %1134 = dma.vmem_to_hbm [thread:$0]  %s1132_s4, 32, %s1788_s5, [#allocation3]  }
 0x301   :  { %1418 = dma.done.wait [#allocation3], 32  }
 0x302   :  { %1419 = vsyncadd [#allocation3], 4294967264 }
 0x303   :  { %1138 = vsyncpa [#allocation3], 1 }

</bundles_post_ra>
